<compile_context>
chip_gen: v7x
topology: tpu7x:2x2x1
jax: 0.10.0
libtpu: 0.0.40
codegen_flags: <defaults>
</compile_context>

<pallas_src>
import jax
import jax.numpy as jnp
from jax.experimental import pallas as pl
from jax.experimental.pallas import tpu as pltpu

LANE = 128


def basic_conv2d_nhwc(x_nhwc, w_oihw, conv_bias, gamma, beta,
                      running_mean, running_var, eps=1e-5):
    """Fused Conv2d(valid, stride 1) + BatchNorm2d(eval) + ReLU. NHWC in/out."""
    N, H, W, Cin = x_nhwc.shape
    Cout, Cin_w, KH, KW = w_oihw.shape
    assert Cin == Cin_w, "channel mismatch"
    Ho, Wo = H - KH + 1, W - KW + 1           # stride=1, padding=0 (Conv2d defaults)
    HoW = Ho * W                              # full-width rows; invalid cols sliced later
    Cout_pad = pl.cdiv(Cout, LANE) * LANE     # lane-dense output / full MXU N-dim

    # ---- fold eval-mode BN (running stats) + conv bias ----
    scale = gamma / jnp.sqrt(running_var + eps)                     # (Cout,)
    bias = beta + (conv_bias - running_mean) * scale                # (Cout,)

    # (Cout,Cin,KH,KW) -> (KH,KW,Cin,Cout); fold BN scale into weights; pad Cout.
    w = jnp.transpose(w_oihw, (2, 3, 1, 0)).astype(jnp.float32) * scale
    w = jnp.pad(w, ((0, 0), (0, 0), (0, 0), (0, Cout_pad - Cout)))
    w = w.reshape(KH * KW, Cin, Cout_pad).astype(jnp.bfloat16)      # bf16 MXU operand

    bias_p = jnp.pad(bias, (0, Cout_pad - Cout)).reshape(1, Cout_pad).astype(jnp.float32)

    # Flatten spatial dims (free reshape) and append KW-1 zero pixels so every
    # shifted in-kernel tap slice [s, s + Ho*W) stays in bounds.
    x_flat = x_nhwc.reshape(N, H * W, Cin)
    x_flat = jnp.pad(x_flat, ((0, 0), (0, KW - 1), (0, 0))).astype(jnp.bfloat16)
    P = H * W + KW - 1

    def kernel(x_ref, w_ref, b_ref, o_ref):
        # x_ref: (1, P, Cin) bf16 flattened image (+ zero tail)
        # w_ref: (KH*KW, Cin, Cout_pad) bf16, BN scale folded in
        # b_ref: (1, Cout_pad) f32 folded bias
        # o_ref: (1, Ho*W, Cout_pad) f32 full-width conv rows
        acc = jnp.zeros((HoW, Cout_pad), jnp.float32)
        for kh in range(KH):
            for kw in range(KW):
                s = kh * W + kw                         # static tap offset
                patch = x_ref[0, s:s + HoW, :]          # (Ho*W, Cin) shifted view
                acc += jnp.dot(patch, w_ref[kh * KW + kw],
                               preferred_element_type=jnp.float32)
        acc = acc + b_ref[...]                          # conv bias + BN bias
        o_ref[0] = jnp.maximum(acc, 0.0).astype(o_ref.dtype)   # ReLU

    out_full = pl.pallas_call(
        kernel,
        out_shape=jax.ShapeDtypeStruct((N, HoW, Cout_pad), jnp.float32),
        grid_spec=pltpu.PrefetchScalarGridSpec(
            num_scalar_prefetch=0,
            grid=(N,),
            in_specs=[
                pl.BlockSpec((1, P, Cin), lambda n: (n, 0, 0)),
                pl.BlockSpec((KH * KW, Cin, Cout_pad), lambda n: (0, 0, 0)),
                pl.BlockSpec((1, Cout_pad), lambda n: (0, 0)),
            ],
            out_specs=pl.BlockSpec((1, HoW, Cout_pad), lambda n: (n, 0, 0)),
        ),
        compiler_params=pltpu.CompilerParams(
            dimension_semantics=("parallel",),          # batch axis -> both TCs on v7x
            vmem_limit_bytes=48 * 1024 * 1024,          # headroom for larger images
        ),
    )(x_flat, w, bias_p)

    # (N, Ho*W, Cout_pad) -> (N, Ho, W, Cout_pad); drop invalid cols / padded channels.
    out = out_full.reshape(N, Ho, W, Cout_pad)[:, :, :Wo, :Cout]
    return out


def basic_conv2d(x_nchw, w_oihw, conv_bias, gamma, beta,
                 running_mean, running_var, eps=1e-5):
    """NCHW adapter matching the PyTorch module interface."""
    x_nhwc = jnp.transpose(x_nchw, (0, 2, 3, 1))
    out = basic_conv2d_nhwc(x_nhwc, w_oihw, conv_bias, gamma, beta,
                            running_mean, running_var, eps)
    return jnp.transpose(out, (0, 3, 1, 2))


if __name__ == "__main__":
    # Module config: BasicConv2d(in_channels=4, out_channels=8, kernel_size=3)
    N, Cin, H, W = 2, 4, 16, 16
    Cout, K = 8, 3

    key = jax.random.PRNGKey(0)
    kx, kw, kb = jax.random.split(key, 3)
    x = jax.random.normal(kx, (N, Cin, H, W), dtype=jnp.float32)
    conv_w = jax.random.normal(kw, (Cout, Cin, K, K), dtype=jnp.float32) * 0.1
    conv_b = jax.random.normal(kb, (Cout,), dtype=jnp.float32) * 0.1

    # BatchNorm2d default parameters / buffers (eval mode)
    gamma = jnp.ones((Cout,), jnp.float32)
    beta = jnp.zeros((Cout,), jnp.float32)
    running_mean = jnp.zeros((Cout,), jnp.float32)
    running_var = jnp.ones((Cout,), jnp.float32)

    y = basic_conv2d(x, conv_w, conv_b, gamma, beta, running_mean, running_var)
    y = jax.block_until_ready(y)

    # Reference: plain JAX conv (f32) + eval-mode BN + ReLU.
    ref = jax.lax.conv_general_dilated(
        x, conv_w, window_strides=(1, 1), padding="VALID",
        dimension_numbers=("NCHW", "OIHW", "NCHW"))
    ref = ref + conv_b.reshape(1, Cout, 1, 1)
    ref = (ref - running_mean.reshape(1, Cout, 1, 1)) / jnp.sqrt(
        running_var.reshape(1, Cout, 1, 1) + 1e-5)
    ref = ref * gamma.reshape(1, Cout, 1, 1) + beta.reshape(1, Cout, 1, 1)
    ref = jnp.maximum(ref, 0.0)

    assert y.shape == (N, Cout, H - K + 1, W - K + 1)
    # bf16 operands with f32 accumulation -> loosened tolerance vs. the f32 reference.
    assert jnp.allclose(y, ref, atol=5e-2, rtol=5e-2), float(jnp.max(jnp.abs(y - ref)))
    print("KERNEL_OK")
</pallas_src>

<mosaic_0001>
module attributes {stable_mosaic.version = 11 : i64} {
  func.func @kernel(%arg0: i32, %arg1: memref<1x258x4xbf16, #tpu.memory_space<vmem>>, %arg2: memref<9x4x128xbf16, #tpu.memory_space<vmem>>, %arg3: memref<1x128xf32, #tpu.memory_space<vmem>>, %arg4: memref<1x224x128xf32, #tpu.memory_space<vmem>>) attributes {dimension_semantics = [#tpu.dimension_semantics<parallel>], iteration_bounds = array<i64: 2>, scalar_prefetch = 0 : i64, scratch_operands = 0 : i64, tpu.core_type = #tpu.core_type<tc>, window_params = [{transform_indices = @transform_0, window_bounds = array<i64: 1, 258, 4>}, {pipeline_mode = #tpu.pipeline_mode<synchronous>, transform_indices = @transform_1, window_bounds = array<i64: 9, 4, 128>}, {pipeline_mode = #tpu.pipeline_mode<synchronous>, transform_indices = @transform_2, window_bounds = array<i64: 1, 128>}, {transform_indices = @transform_3, window_bounds = array<i64: 1, 224, 128>}]} {
    %cst = arith.constant 0.000000e+00 : f32
    %0 = vector.broadcast %cst : f32 to vector<224x128xf32>
    %c0 = arith.constant 0 : index
    %c0_0 = arith.constant 0 : index
    %c0_1 = arith.constant 0 : index
    %1 = vector.load %arg1[%c0, %c0_0, %c0_1] : memref<1x258x4xbf16, #tpu.memory_space<vmem>>, vector<1x224x4xbf16>
    %2 = vector.shape_cast %1 : vector<1x224x4xbf16> to vector<224x4xbf16>
    %c0_2 = arith.constant 0 : index
    %c0_3 = arith.constant 0 : index
    %c0_4 = arith.constant 0 : index
    %3 = vector.load %arg2[%c0_2, %c0_3, %c0_4] : memref<9x4x128xbf16, #tpu.memory_space<vmem>>, vector<1x4x128xbf16>
    %4 = vector.shape_cast %3 : vector<1x4x128xbf16> to vector<4x128xbf16>
    %cst_5 = arith.constant dense<0.000000e+00> : vector<224x128xf32>
    %5 = tpu.matmul %2, %4, %cst_5 {dimension_numbers = #tpu.dot_dimension_numbers<[1], [0], [0], [1], [0, 0, 1, 1], [], []>} : vector<224x4xbf16>, vector<4x128xbf16>, vector<224x128xf32> -> vector<224x128xf32>
    %6 = arith.addf %0, %5 : vector<224x128xf32>
    %c0_6 = arith.constant 0 : index
    %c1 = arith.constant 1 : index
    %c0_7 = arith.constant 0 : index
    %7 = vector.load %arg1[%c0_6, %c1, %c0_7] : memref<1x258x4xbf16, #tpu.memory_space<vmem>>, vector<1x224x4xbf16>
    %8 = vector.shape_cast %7 : vector<1x224x4xbf16> to vector<224x4xbf16>
    %c1_8 = arith.constant 1 : index
    %c0_9 = arith.constant 0 : index
    %c0_10 = arith.constant 0 : index
    %9 = vector.load %arg2[%c1_8, %c0_9, %c0_10] : memref<9x4x128xbf16, #tpu.memory_space<vmem>>, vector<1x4x128xbf16>
    %10 = vector.shape_cast %9 : vector<1x4x128xbf16> to vector<4x128xbf16>
    %cst_11 = arith.constant dense<0.000000e+00> : vector<224x128xf32>
    %11 = tpu.matmul %8, %10, %cst_11 {dimension_numbers = #tpu.dot_dimension_numbers<[1], [0], [0], [1], [0, 0, 1, 1], [], []>} : vector<224x4xbf16>, vector<4x128xbf16>, vector<224x128xf32> -> vector<224x128xf32>
    %12 = arith.addf %6, %11 : vector<224x128xf32>
    %c0_12 = arith.constant 0 : index
    %c2 = arith.constant 2 : index
    %c0_13 = arith.constant 0 : index
    %13 = vector.load %arg1[%c0_12, %c2, %c0_13] : memref<1x258x4xbf16, #tpu.memory_space<vmem>>, vector<1x224x4xbf16>
    %14 = vector.shape_cast %13 : vector<1x224x4xbf16> to vector<224x4xbf16>
    %c2_14 = arith.constant 2 : index
    %c0_15 = arith.constant 0 : index
    %c0_16 = arith.constant 0 : index
    %15 = vector.load %arg2[%c2_14, %c0_15, %c0_16] : memref<9x4x128xbf16, #tpu.memory_space<vmem>>, vector<1x4x128xbf16>
    %16 = vector.shape_cast %15 : vector<1x4x128xbf16> to vector<4x128xbf16>
    %cst_17 = arith.constant dense<0.000000e+00> : vector<224x128xf32>
    %17 = tpu.matmul %14, %16, %cst_17 {dimension_numbers = #tpu.dot_dimension_numbers<[1], [0], [0], [1], [0, 0, 1, 1], [], []>} : vector<224x4xbf16>, vector<4x128xbf16>, vector<224x128xf32> -> vector<224x128xf32>
    %18 = arith.addf %12, %17 : vector<224x128xf32>
    %c0_18 = arith.constant 0 : index
    %c16 = arith.constant 16 : index
    %c0_19 = arith.constant 0 : index
    %19 = vector.load %arg1[%c0_18, %c16, %c0_19] : memref<1x258x4xbf16, #tpu.memory_space<vmem>>, vector<1x224x4xbf16>
    %20 = vector.shape_cast %19 : vector<1x224x4xbf16> to vector<224x4xbf16>
    %c3 = arith.constant 3 : index
    %c0_20 = arith.constant 0 : index
    %c0_21 = arith.constant 0 : index
    %21 = vector.load %arg2[%c3, %c0_20, %c0_21] : memref<9x4x128xbf16, #tpu.memory_space<vmem>>, vector<1x4x128xbf16>
    %22 = vector.shape_cast %21 : vector<1x4x128xbf16> to vector<4x128xbf16>
    %cst_22 = arith.constant dense<0.000000e+00> : vector<224x128xf32>
    %23 = tpu.matmul %20, %22, %cst_22 {dimension_numbers = #tpu.dot_dimension_numbers<[1], [0], [0], [1], [0, 0, 1, 1], [], []>} : vector<224x4xbf16>, vector<4x128xbf16>, vector<224x128xf32> -> vector<224x128xf32>
    %24 = arith.addf %18, %23 : vector<224x128xf32>
    %c0_23 = arith.constant 0 : index
    %c17 = arith.constant 17 : index
    %c0_24 = arith.constant 0 : index
    %25 = vector.load %arg1[%c0_23, %c17, %c0_24] : memref<1x258x4xbf16, #tpu.memory_space<vmem>>, vector<1x224x4xbf16>
    %26 = vector.shape_cast %25 : vector<1x224x4xbf16> to vector<224x4xbf16>
    %c4 = arith.constant 4 : index
    %c0_25 = arith.constant 0 : index
    %c0_26 = arith.constant 0 : index
    %27 = vector.load %arg2[%c4, %c0_25, %c0_26] : memref<9x4x128xbf16, #tpu.memory_space<vmem>>, vector<1x4x128xbf16>
    %28 = vector.shape_cast %27 : vector<1x4x128xbf16> to vector<4x128xbf16>
    %cst_27 = arith.constant dense<0.000000e+00> : vector<224x128xf32>
    %29 = tpu.matmul %26, %28, %cst_27 {dimension_numbers = #tpu.dot_dimension_numbers<[1], [0], [0], [1], [0, 0, 1, 1], [], []>} : vector<224x4xbf16>, vector<4x128xbf16>, vector<224x128xf32> -> vector<224x128xf32>
    %30 = arith.addf %24, %29 : vector<224x128xf32>
    %c0_28 = arith.constant 0 : index
    %c18 = arith.constant 18 : index
    %c0_29 = arith.constant 0 : index
    %31 = vector.load %arg1[%c0_28, %c18, %c0_29] : memref<1x258x4xbf16, #tpu.memory_space<vmem>>, vector<1x224x4xbf16>
    %32 = vector.shape_cast %31 : vector<1x224x4xbf16> to vector<224x4xbf16>
    %c5 = arith.constant 5 : index
    %c0_30 = arith.constant 0 : index
    %c0_31 = arith.constant 0 : index
    %33 = vector.load %arg2[%c5, %c0_30, %c0_31] : memref<9x4x128xbf16, #tpu.memory_space<vmem>>, vector<1x4x128xbf16>
    %34 = vector.shape_cast %33 : vector<1x4x128xbf16> to vector<4x128xbf16>
    %cst_32 = arith.constant dense<0.000000e+00> : vector<224x128xf32>
    %35 = tpu.matmul %32, %34, %cst_32 {dimension_numbers = #tpu.dot_dimension_numbers<[1], [0], [0], [1], [0, 0, 1, 1], [], []>} : vector<224x4xbf16>, vector<4x128xbf16>, vector<224x128xf32> -> vector<224x128xf32>
    %36 = arith.addf %30, %35 : vector<224x128xf32>
    %c0_33 = arith.constant 0 : index
    %c32 = arith.constant 32 : index
    %c0_34 = arith.constant 0 : index
    %37 = vector.load %arg1[%c0_33, %c32, %c0_34] : memref<1x258x4xbf16, #tpu.memory_space<vmem>>, vector<1x224x4xbf16>
    %38 = vector.shape_cast %37 : vector<1x224x4xbf16> to vector<224x4xbf16>
    %c6 = arith.constant 6 : index
    %c0_35 = arith.constant 0 : index
    %c0_36 = arith.constant 0 : index
    %39 = vector.load %arg2[%c6, %c0_35, %c0_36] : memref<9x4x128xbf16, #tpu.memory_space<vmem>>, vector<1x4x128xbf16>
    %40 = vector.shape_cast %39 : vector<1x4x128xbf16> to vector<4x128xbf16>
    %cst_37 = arith.constant dense<0.000000e+00> : vector<224x128xf32>
    %41 = tpu.matmul %38, %40, %cst_37 {dimension_numbers = #tpu.dot_dimension_numbers<[1], [0], [0], [1], [0, 0, 1, 1], [], []>} : vector<224x4xbf16>, vector<4x128xbf16>, vector<224x128xf32> -> vector<224x128xf32>
    %42 = arith.addf %36, %41 : vector<224x128xf32>
    %c0_38 = arith.constant 0 : index
    %c33 = arith.constant 33 : index
    %c0_39 = arith.constant 0 : index
    %43 = vector.load %arg1[%c0_38, %c33, %c0_39] : memref<1x258x4xbf16, #tpu.memory_space<vmem>>, vector<1x224x4xbf16>
    %44 = vector.shape_cast %43 : vector<1x224x4xbf16> to vector<224x4xbf16>
    %c7 = arith.constant 7 : index
    %c0_40 = arith.constant 0 : index
    %c0_41 = arith.constant 0 : index
    %45 = vector.load %arg2[%c7, %c0_40, %c0_41] : memref<9x4x128xbf16, #tpu.memory_space<vmem>>, vector<1x4x128xbf16>
    %46 = vector.shape_cast %45 : vector<1x4x128xbf16> to vector<4x128xbf16>
    %cst_42 = arith.constant dense<0.000000e+00> : vector<224x128xf32>
    %47 = tpu.matmul %44, %46, %cst_42 {dimension_numbers = #tpu.dot_dimension_numbers<[1], [0], [0], [1], [0, 0, 1, 1], [], []>} : vector<224x4xbf16>, vector<4x128xbf16>, vector<224x128xf32> -> vector<224x128xf32>
    %48 = arith.addf %42, %47 : vector<224x128xf32>
    %c0_43 = arith.constant 0 : index
    %c34 = arith.constant 34 : index
    %c0_44 = arith.constant 0 : index
    %49 = vector.load %arg1[%c0_43, %c34, %c0_44] : memref<1x258x4xbf16, #tpu.memory_space<vmem>>, vector<1x224x4xbf16>
    %50 = vector.shape_cast %49 : vector<1x224x4xbf16> to vector<224x4xbf16>
    %c8 = arith.constant 8 : index
    %c0_45 = arith.constant 0 : index
    %c0_46 = arith.constant 0 : index
    %51 = vector.load %arg2[%c8, %c0_45, %c0_46] : memref<9x4x128xbf16, #tpu.memory_space<vmem>>, vector<1x4x128xbf16>
    %52 = vector.shape_cast %51 : vector<1x4x128xbf16> to vector<4x128xbf16>
    %cst_47 = arith.constant dense<0.000000e+00> : vector<224x128xf32>
    %53 = tpu.matmul %50, %52, %cst_47 {dimension_numbers = #tpu.dot_dimension_numbers<[1], [0], [0], [1], [0, 0, 1, 1], [], []>} : vector<224x4xbf16>, vector<4x128xbf16>, vector<224x128xf32> -> vector<224x128xf32>
    %54 = arith.addf %48, %53 : vector<224x128xf32>
    %c0_48 = arith.constant 0 : index
    %c0_49 = arith.constant 0 : index
    %55 = vector.load %arg3[%c0_48, %c0_49] : memref<1x128xf32, #tpu.memory_space<vmem>>, vector<1x128xf32>
    %56 = vector.broadcast %55 : vector<1x128xf32> to vector<224x128xf32>
    %57 = arith.addf %54, %56 : vector<224x128xf32>
    %cst_50 = arith.constant 0.000000e+00 : f32
    %58 = vector.broadcast %cst_50 : f32 to vector<224x128xf32>
    %59 = arith.maximumf %57, %58 : vector<224x128xf32>
    %c0_51 = arith.constant 0 : index
    %c0_52 = arith.constant 0 : index
    %c0_53 = arith.constant 0 : index
    %60 = vector.load %arg4[%c0_51, %c0_52, %c0_53] : memref<1x224x128xf32, #tpu.memory_space<vmem>>, vector<1x224x128xf32>
    %61 = vector.shape_cast %60 : vector<1x224x128xf32> to vector<224x128xf32>
    %62 = vector.shape_cast %59 : vector<224x128xf32> to vector<1x224x128xf32>
    tpu.vector_store %arg4[%c0_51, %c0_52, %c0_53], %62 {strides = array<i32>} : memref<1x224x128xf32, #tpu.memory_space<vmem>>, vector<1x224x128xf32>,
    return
  }
  func.func @transform_0(%arg0: i32) -> (i32, i32, i32) {
    %c0_i32 = arith.constant 0 : i32
    %c0_i32_0 = arith.constant 0 : i32
    %c0_i32_1 = arith.constant 0 : i32
    return %arg0, %c0_i32, %c0_i32_0 : i32, i32, i32
  }
  func.func @transform_1(%arg0: i32) -> (i32, i32, i32) {
    %c0_i32 = arith.constant 0 : i32
    %c0_i32_0 = arith.constant 0 : i32
    %c0_i32_1 = arith.constant 0 : i32
    %c0_i32_2 = arith.constant 0 : i32
    return %c0_i32, %c0_i32_0, %c0_i32_1 : i32, i32, i32
  }
  func.func @transform_2(%arg0: i32) -> (i32, i32) {
    %c0_i32 = arith.constant 0 : i32
    %c0_i32_0 = arith.constant 0 : i32
    %c0_i32_1 = arith.constant 0 : i32
    return %c0_i32, %c0_i32_0 : i32, i32
  }
  func.func @transform_3(%arg0: i32) -> (i32, i32, i32) {
    %c0_i32 = arith.constant 0 : i32
    %c0_i32_0 = arith.constant 0 : i32
    %c0_i32_1 = arith.constant 0 : i32
    return %arg0, %c0_i32, %c0_i32_0 : i32, i32, i32
  }
}

</mosaic_0001>

<bundles_post_ra>
// kernel: tpu_custom_call.1
= control target key start
LH: loop header
LB: loop body
LE: loop exit
PB: predicated region body
PF: predicated region fallthrough
CT: control target
= control target key end

     0   :  { %8 = vsyncpa [#allocation3], 0  ;;  %s5065_s0 = inlined_call_operand.vmem [shape: bf16[2,258,4], index: 0, kind: input, shape index: {}]   ;;  %s5066_s1 = inlined_call_operand.vmem [shape: bf16[9,4,128], index: 1, kind: input, shape index: {}]   ;;  %s5067_s2 = inlined_call_operand.vmem [shape: f32[1,128], index: 2, kind: input, shape index: {}]   ;;  %s5068_s3 = inlined_call_operand.hbm [shape: f32[2,224,128], index: 3, kind: output, shape index: {}]  }
   0x1   :  { %10 = vsyncpa [#allocation3 + $0x1], 0  ;;  %s4266_s12 = smov 0   ;;  %s4268_s13 = smov 0  }
   0x2   :  { %s4270_s14 = smov 0   ;;  %s4272_s15 = smov 0  }
   0x3 LB: > { %s4287_s16 = sadd.s32 4294967295, %s4241_s15   ;;  %s3199_s17 = sadd.s32 4294967294, %s4241_s15   ;;  %s4241_s15 = sphi %s4272_s15, %s5074_s15   ;;  %s4237_s14 = sphi %s4270_s14, %s5073_s14   ;;  %s4233_s13 = sphi %s4268_s13, %s5072_s13   ;;  %s4229_s12 = sphi %s4266_s12, %s5071_s12  }
   0x4   : > { %s4291_s18 = sadd.s32 1, %s4241_s15   ;;  %s91_s19 = sadd.s32 1, %s4237_s14 }
   0x5   : > { %s88_s20 = ssub.s32 %s4241_s15, %s4291_s18  ;;  %p101_p0 = scmp.ne.s32.totalorder %s4237_s14, %s4233_s13 }
   0x6   : > { %p89_p1 = scmp.eq.s32.totalorder %s88_s20, 0  ;;  %p102_p2 = scmp.eq.s32.totalorder %s4287_s16, 1 }
   0x7   : > { %p107_p3 = scmp.ne.s32.totalorder %s4233_s13, %s4229_s12  ;;  %p108_p4 = scmp.eq.s32.totalorder %s3199_s17, 1 }
   0x8   : > { %s4302_s21 = scalar_select %p89_p1, %s4237_s14, %s91_s19  }
   0x9   : > { %p4304_p5 = por %p102_p2, %p101_p0  ;;  %p4308_p6 = por %p108_p4, %p107_p3 }
   0xa   : > { %p3202_p7 = scmp.ge.s32.totalorder %s4241_s15, 1  ;;  %p140_p8 = scmp.lt.s32.totalorder %s4241_s15, 3 }
   0xc   : > { %p141_p9 = pnand %p3202_p7, %p140_p8 }
   0xd   : > { %vm435_vm0 = vcmask (!%p141_p9), 1041408   ;;  %v4317_v0 = vld [vmem:[%s5066_s1 + $0x8] sm:$0x3] (!%p141_p9)  ;;  %v3204_v1 = vld [vmem:[%s5066_s1 + $0x2] sm:$0x3] (!%p141_p9)  ;;  %p164_p10 = scmp.lt.s32.totalorder (!%p141_p9), %s4287_s16, 1 }
   0xe   : > { %144 = sbr.rel (%p141_p9) target bundleno = 523 (0x20b), region = 32  ;;  %4053 = vmatprep.subr.msk.bf16.mxu0 (!%p141_p9), %vm435_vm0, %v4317_v0  ;;  %4049 = vmatprep.subr.msk.bf16.mxu1 (!%p141_p9), %vm435_vm0, %v3204_v1  ;;  %v4328_v2 = vsel (!%p141_p9), %vm435_vm0, %v4317_v0, 0  ;;  %v437_v3 = vsel (!%p141_p9), %vm435_vm0, %v3204_v1, 0  ;;  %v3323_v4 = vld [vmem:[%s5066_s1 + $0xa] sm:$0x3] (!%p141_p9)  ;;  %vm392_vm2 = vcmask (!%p141_p9), 31744  }
   0xf   : > { %3674 = vmatpush3.bf16.msra.mxu0 (!%p141_p9), %v4328_v2  ;;  %3554 = vmatpush3.bf16.msra.mxu1 (!%p141_p9), %v437_v3  ;;  %v198_v5 = vld [vmem:[%s5066_s1] sm:$0x3] (!%p141_p9)  ;;  %vm275_vm1 = vsmask.f32 (!%p141_p9), 7424  ;;  %v4347_v6 = vsel (!%p141_p9), %vm435_vm0, %v3323_v4, 0  ;;  %vm766_vm3 = vcmask (!%p141_p9), 1046528  }
  0x10   : > { %4055 = vmatprep.subr.msk.bf16.mxu0 (!%p141_p9), %vm435_vm0, %v3323_v4  ;;  %4050 = vmatprep.subr.msk.bf16.mxu1 (!%p141_p9), %vm435_vm0, %v198_v5  ;;  %v613_v12 = vsel (!%p141_p9), %vm435_vm0, %v198_v5, 0  ;;  %v4393_v39 = vld [vmem:[%s5066_s1 + $0x4] sm:$0x3] (!%p141_p9)  ;;  %v4411_v53 = vld [vmem:[%s5066_s1 + $0xc] sm:$0x3] (!%p141_p9)  ;;  %s161_s29 = sand.u32 (!%p141_p9), 1, %s4233_s13  }
  0x11   : > { %s4059_s30 = smul.u32 (!%p141_p9), 224, %s161_s29  ;;  %s4243_s19 = smov (!%p141_p9), [#allocation2]  }
  0x12   : > { %s4061_s7 = smul.u32 (!%p141_p9), 3584, %s4287_s16  ;;  %s4183_s20 = sshll.u32 (!%p141_p9), %s4243_s19, 4  ;;  %s4184_s20 = int_to_ptr.vmem [resolvable:$false] %s4183_s20 }
  0x13   : > { %s4185_s24 = scalar_lea.vmem (!%p141_p9), %s4184_s20, 7168 }
  0x14   : > { %s5015_s11 = scalar_lea.hbm (!%p141_p9), %s5068_s3, %s4061_s7 }
  0x15   : > { %s165_s28 = scalar_select %p164_p10, %s4287_s16, 1 }
  0x16   : > { %s5024_s16 = scalar_lea.sflag [#allocation3], %s161_s29 }
  0x17   : > { %s4060_s6 = smul.u32 132, %s165_s28 }
  0x19   : > { %s4344_s9 = scalar_lea.vmem %s5065_s0, %s4060_s6  ;;  %s4955_s6 = scalar_lea.vmem [#allocation2], %s4059_s30 }
  0x1a   : > { %v170_v7 = vld [vmem:[%s4344_s9] sm:$0xf]  ;;  %v4351_v8 = vld [vmem:[%s4344_s9 + $0x4] sm:$0xf]  ;;  %v4357_v10 = vld [vmem:[%s4344_s9 + $0x8] sm:$0xff]   ;;  %s3137_s8 = sshll.u32 %s4955_s6, 4  ;;  %s5017_s8 = int_to_ptr.vmem [resolvable:$true] %s3137_s8 }
  0x1b   : > { %v4354_v9 = vcombine.low %v170_v7, %v4351_v8  ;;  %v1332_v11 = vld [vmem:[%s4344_s9 + $0x8] sm:$0xf]  ;;  %v4362_v13 = vld [vmem:[%s4344_s9 + $0xc] sm:$0xf]  ;;  %v284_v16 = vshll.u32 %v4357_v10, 16  ;;  %v288_v17 = vshrl.u32 %v4357_v10, 16  ;;  %p4186_p0 = scmp.lt.s32.totalorder %s5017_s8, %s4184_s20 }
  0x1c   : > { %v4369_v18 = vld [vmem:[%s4344_s9 + $0x10] sm:$0xff]   ;;  %v3294_v20 = vcombine.low %v1332_v11, %v4362_v13  ;;  %v4379_v28 = vld [vmem:[%s4344_s9 + $0x18] sm:$0xff]   ;;  %v4386_v34 = vld [vmem:[%s4344_s9 + $0x20] sm:$0xff]   ;;  %s4179_s17 = scalar_lea.vmem %s5017_s8, 3584 }
  0x1d   : > { %v277_v14 = vshrl.u32 %v4354_v9, 16  ;;  %v279_v15 = vshll.u32 %v4354_v9, 16  ;;  %v4372_v19 = vld [vmem:[%s4344_s9 + $0x10] sm:$0xff]   ;;  %v286_v22 = vrot.slane %v284_v16, 1  ;;  %v1444_v23 = vshll.u32 %v4369_v18, 16  ;;  %v4382_v32 = vld [vmem:[%s4344_s9 + $0x18] sm:$0xff]   ;;  %p4180_p11 = scmp.ne.s32.totalorder %s5017_s8, %s4179_s17  ;;  %p4187_p1 = scmp.lt.s32.totalorder %s4185_s24, %s4179_s17 }
  0x1e   : > { %v1448_v24 = vshrl.u32 %v4369_v18, 16  ;;  %v1437_v25 = vshrl.u32 %v3294_v20, 16  ;;  %v1439_v26 = vshll.u32 %v3294_v20, 16  ;;  %v292_v27 = vshll.u32 %v4372_v19, 16  ;;  %v4401_v48 = vld [vmem:[%s4344_s9 + $0x20] sm:$0xff]   ;;  %v4406_v52 = vld [vmem:[%s4344_s9 + $0x28] sm:$0xff]  }
  0x1f   : > { %v281_v21 = vrot.slane %v279_v15, 1  ;;  %v290_v30 = vor.u32 %v288_v17, %v286_v22  ;;  %v1446_v31 = vrot.slane %v1444_v23, 1  ;;  %v296_v33 = vshrl.u32 %v4372_v19, 16  ;;  %v4417_v58 = vld [vmem:[%s4344_s9 + $0x28] sm:$0xff]   ;;  %v4431_v5 = vld [vmem:[%s4344_s9 + $0x30] sm:$0xff]   ;;  %v4446_v23 = vld [vmem:[%s4344_s9 + $0x38] sm:$0xff]   ;;  %p4181_p12 = pnand %p4180_p11, %p4304_p5  ;;  %p4188_p2 = por %p4187_p1, %p4186_p0 }
  0x20   : > { %v1441_v35 = vrot.slane %v1439_v26, 1  ;;  %v294_v36 = vrot.slane %v292_v27, 1  ;;  %v1452_v37 = vshll.u32 %v4379_v28, 16  ;;  %v1456_v38 = vshrl.u32 %v4379_v28, 16 }
  0x21   : > { %v282_v29 = vor.u32 %v281_v21, %v277_v14  ;;  %v1450_v41 = vor.u32 %v1448_v24, %v1446_v31  ;;  %v300_v42 = vshll.u32 %v4382_v32, 16  ;;  %v1460_v43 = vshll.u32 %v4386_v34, 16  ;;  %v4437_v14 = vld [vmem:[%s4344_s9 + $0x30] sm:$0xff]   ;;  %p4182_p13 = pneg %p4181_p12 }
  0x22   : > { %v1442_v44 = vor.u32 %v1441_v35, %v1437_v25  ;;  %v295_v45 = vsel %vm275_vm1, %v290_v30, %v294_v36  ;;  %v1454_v46 = vrot.slane %v1452_v37, 1  ;;  %v298_v47 = vor.u32 %v296_v33, %v294_v36  ;;  %v4450_v25 = vld [vmem:[%s4344_s9 + $0x38] sm:$0xff]   ;;  %v4459_v36 = vld [vmem:[%s4344_s9 + $0x40] sm:$0xff]  }
  0x23   : > { %v287_v40 = vsel %vm275_vm1, %v282_v29, %v286_v22  ;;  %v302_v49 = vrot.slane %v300_v42, 1  ;;  %v1462_v50 = vrot.slane %v1460_v43, 1  ;;  %v304_v51 = vshrl.u32 %v4382_v32, 16  ;;  %p4189_p3 = pnand %p4188_p2, %p4182_p13 }
  0x24   : > { %3555 = vmatprep.mubr.msk.bf16.mxu1 %vm392_vm2, %v287_v40  ;;  %v1447_v54 = vsel %vm275_vm1, %v1442_v44, %v1446_v31  ;;  %v1455_v55 = vsel %vm275_vm1, %v1450_v41, %v1454_v46  ;;  %v1458_v56 = vor.u32 %v1456_v38, %v1454_v46  ;;  %v308_v57 = vshll.u32 %v4401_v48, 16  ;;  %v4465_v41 = vld [vmem:[%s4344_s9 + $0x40] sm:$0xff]   ;;  %v4470_v46 = vld [vmem:[%s4344_s9 + $0x48] sm:$0xff]  }
  0x25   : > { %3556 = vmatmul.mubr.msk.bf16.vlgmr.msra.gmra.mrb[0].mxu1 %vm392_vm2, %v295_v45  ;;  %3675 = vmatprep.mubr.msk.bf16.mxu0 %vm392_vm2, %v1447_v54  ;;  %v303_v59 = vsel %vm275_vm1, %v298_v47, %v302_v49  ;;  %v306_v60 = vor.u32 %v304_v51, %v302_v49  ;;  %v1464_v61 = vshrl.u32 %v4386_v34, 16  ;;  %v1468_v62 = vshll.u32 %v4406_v52, 16 }
  0x26   : > { %3584 = vmatpush3.bf16.msra.mxu1 %v613_v12  ;;  %3676 = vmatmul.mubr.msk.bf16.vlgmr.msra.gmra.mrb[0].mxu0 %vm392_vm2, %v1455_v55  ;;  %v1463_v63 = vsel %vm275_vm1, %v1458_v56, %v1462_v50  ;;  %v310_v1 = vrot.slane %v308_v57, 1  ;;  %v312_v3 = vshrl.u32 %v4401_v48, 16  ;;  %v316_v4 = vshll.u32 %v4417_v58, 16  ;;  %v1770_v57 = vld [vmem:[%s4344_s9 + $0x8] sm:$0xe] }
  0x27   : > { %4051 = vmatprep.subr.msk.bf16.mxu1 %vm435_vm0, %v4393_v39  ;;  %3559 = vmatprep.mubr.msk.bf16.mxu1 %vm392_vm2, %v303_v59  ;;  %v1466_v7 = vor.u32 %v1464_v61, %v1462_v50  ;;  %v1470_v11 = vrot.slane %v1468_v62, 1  ;;  %v1472_v12 = vshrl.u32 %v4406_v52, 16  ;;  %v320_v15 = vshrl.u32 %v4417_v58, 16  ;;  %v4475_v50 = vld [vmem:[%s4344_s9 + $0x48] sm:$0xff]  }
  0x28   : > { %3704 = vmatpush3.bf16.msra.mxu0 %v4347_v6  ;;  %3679 = vmatprep.mubr.msk.bf16.mxu0 %vm392_vm2, %v1463_v63  ;;  %v311_v16 = vsel %vm275_vm1, %v306_v60, %v310_v1  ;;  %v314_v17 = vor.u32 %v312_v3, %v310_v1  ;;  %v318_v20 = vrot.slane %v316_v4, 1  ;;  %v1476_v21 = vshll.u32 %v4431_v5, 16  ;;  %v4488_v4 = vld [vmem:[%s4344_s9 + $0x50] sm:$0xff]  }
  0x29   : > { %4056 = vmatprep.subr.msk.bf16.mxu0 %vm435_vm0, %v4411_v53  ;;  %v1474_v6 = vor.u32 %v1472_v12, %v1470_v11  ;;  %v324_v22 = vshll.u32 %v4437_v14, 16  ;;  %v1480_v24 = vshrl.u32 %v4431_v5, 16  ;;  %v328_v29 = vshrl.u32 %v4437_v14, 16 }
  0x2a   : > { %v319_v26 = vsel %vm275_vm1, %v314_v17, %v318_v20  ;;  %v1478_v27 = vrot.slane %v1476_v21, 1  ;;  %v1471_v30 = vsel %vm275_vm1, %v1466_v7, %v1470_v11  ;;  %v1484_v33 = vshll.u32 %v4446_v23, 16  ;;  %v4494_v17 = vld [vmem:[%s4344_s9 + $0x58] sm:$0xff]  }
  0x2b   : > { %v326_v31 = vrot.slane %v324_v22, 1  ;;  %v332_v35 = vshll.u32 %v4450_v25, 16  ;;  %v322_v38 = vor.u32 %v320_v15, %v318_v20  ;;  %v1488_v40 = vshrl.u32 %v4446_v23, 16 }
  0x2c   : > { %v1479_v37 = vsel %vm275_vm1, %v1474_v6, %v1478_v27  ;;  %v1486_v44 = vrot.slane %v1484_v33, 1  ;;  %v1492_v45 = vshll.u32 %v4459_v36, 16  ;;  %v1482_v47 = vor.u32 %v1480_v24, %v1478_v27 }
  0x2d   : > { %3560 = vmatmul.mubr.msk.bf16.gmra.mrb[4].mxu1 %vm392_vm2, %v311_v16  ;;  %v330_v42 = vor.u32 %v328_v29, %v326_v31  ;;  %v334_v43 = vrot.slane %v332_v35, 1  ;;  %v340_v49 = vshll.u32 %v4465_v41, 16  ;;  %v327_v51 = vsel %vm275_vm1, %v322_v38, %v326_v31  ;;  %v4511_v35 = vld [vmem:[%s4344_s9 + $0x60] sm:$0xff]   ;;  %v4516_v38 = vld [vmem:[%s4344_s9 + $0x68] sm:$0xff]  }
  0x2e   : > { %3563 = vmatprep.mubr.msk.bf16.mxu1 %vm392_vm2, %v319_v26  ;;  %3680 = vmatmul.mubr.msk.bf16.gmra.mrb[4].mxu0 %vm392_vm2, %v1471_v30  ;;  %v1490_v54 = vor.u32 %v1488_v40, %v1486_v44  ;;  %v1494_v55 = vrot.slane %v1492_v45, 1  ;;  %v336_v56 = vshrl.u32 %v4450_v25, 16  ;;  %v344_v60 = vshrl.u32 %v4465_v41, 16 }
  0x2f   : > { %3683 = vmatprep.mubr.msk.bf16.mxu0 %vm392_vm2, %v1479_v37  ;;  %v335_v59 = vsel %vm275_vm1, %v330_v42, %v334_v43  ;;  %v348_v61 = vshll.u32 %v4470_v46, 16  ;;  %v1487_v62 = vsel %vm275_vm1, %v1482_v47, %v1486_v44  ;;  %v342_v63 = vrot.slane %v340_v49, 1 }
  0x30   : > { %v1496_v1 = vshrl.u32 %v4459_v36, 16  ;;  %v1500_v3 = vshll.u32 %v4475_v50, 16  ;;  %v1495_v7 = vsel %vm275_vm1, %v1490_v54, %v1494_v55  ;;  %v338_v11 = vor.u32 %v336_v56, %v334_v43 }
  0x31   : > { %v3324_v12 = vcombine.low %v1770_v57, %v4362_v13  ;;  %v346_v15 = vor.u32 %v344_v60, %v342_v63  ;;  %v350_v16 = vrot.slane %v348_v61, 1  ;;  %v356_v6 = vshll.u32 %v4488_v4, 16  ;;  %v4540_v61 = vld [vmem:[%s5066_s1 + $0xe] sm:$0x3] }
  0x32   : > { %v1498_v20 = vor.u32 %v1496_v1, %v1494_v55  ;;  %v4498_v21 = vrot.slane %v1500_v3, 1  ;;  %v343_v22 = vsel %vm275_vm1, %v338_v11, %v342_v63  ;;  %v1777_v13 = vrot.slane %v4369_v18, 1  ;;  %v760_v11 = vld [vmem:[%s4344_s9] sm:$0xe] }
  0x33   : > { %v1776_v24 = vrot.slane %v3324_v12, 1  ;;  %v352_v26 = vshrl.u32 %v4470_v46, 16  ;;  %v351_v27 = vsel %vm275_vm1, %v346_v15, %v350_v16  ;;  %v360_v29 = vshrl.u32 %v4488_v4, 16 }
  0x34   : > { %v364_v30 = vshll.u32 %v4494_v17, 16  ;;  %v1503_v31 = vsel %vm275_vm1, %v1498_v20, %v4498_v21  ;;  %v358_v33 = vrot.slane %v356_v6, 1  ;;  %v1779_v43 = vrot.slane %v4379_v28, 1  ;;  %v4530_v28 = vld [vmem:[%s4344_s9 + $0x70] ss:$0 sps:$4 sm:$0x11]  }
  0x35   : > { %3564 = vmatmul.mubr.msk.bf16.gmra.mrb[8].mxu1 %vm392_vm2, %v327_v51  ;;  %v1778_v18 = vsel %vm766_vm3, %v1776_v24, %v1777_v13  ;;  %v354_v37 = vor.u32 %v352_v26, %v350_v16  ;;  %v1781_v44 = vrot.slane %v4386_v34, 1  ;;  %v372_v45 = vshll.u32 %v4511_v35, 16 }
  0x36   : > { %3567 = vmatprep.mubr.msk.bf16.mxu1 %vm392_vm2, %v335_v59  ;;  %3684 = vmatmul.mubr.msk.bf16.gmra.mrb[8].mxu0 %vm392_vm2, %v1487_v62  ;;  %v362_v40 = vor.u32 %v360_v29, %v358_v33  ;;  %v366_v42 = vrot.slane %v364_v30, 1  ;;  %v368_v49 = vshrl.u32 %v4494_v17, 16  ;;  %v380_v51 = vshll.u32 %v4516_v38, 16 }
  0x37   : > { %3687 = vmatprep.mubr.msk.bf16.mxu0 %vm392_vm2, %v1495_v7  ;;  %v359_v47 = vsel %vm275_vm1, %v354_v37, %v358_v33  ;;  %v376_v55 = vshrl.u32 %v4511_v35, 16  ;;  %v768_v56 = vrot.slane %v4357_v10, 1  ;;  %v770_v57 = vrot.slane %v4372_v19, 1 }
  0x38   : > { %v367_v54 = vsel %vm275_vm1, %v362_v40, %v366_v42  ;;  %v1780_v34 = vsel %vm766_vm3, %v1777_v13, %v1779_v43  ;;  %v2166_v59 = vsel %vm435_vm0, %v4411_v53, 0  ;;  %v374_v60 = vrot.slane %v372_v45, 1  ;;  %v4608_v45 = vld [vmem:[%s4344_s9 + $0x68] sm:$0xff]  }
  0x39   : > { %v1782_v62 = vsel %vm766_vm3, %v1779_v43, %v1781_v44  ;;  %v370_v63 = vor.u32 %v368_v49, %v366_v42  ;;  %v382_v1 = vrot.slane %v380_v51, 1  ;;  %v4547_v3 = vsel %vm766_vm3, %v768_v56, %v770_v57  ;;  %v4594_v42 = vld [vmem:[%s4344_s9 + $0x58] sm:$0xff]   ;;  %v4617_v51 = vld [vmem:[%s4344_s9 + $0x70] sm:$0xff]  }
  0x3a   : > { %v378_v7 = vor.u32 %v376_v55, %v374_v60  ;;  %v1783_v53 = vrot.slane %v4406_v52, 1  ;;  %v3249_v12 = vcombine.low %v760_v11, %v4351_v8  ;;  %v1785_v15 = vrot.slane %v4431_v5, 1 }
  0x3b   : > { %v384_v16 = vshrl.u32 %v4516_v38, 16  ;;  %v375_v20 = vsel %vm275_vm1, %v370_v63, %v374_v60  ;;  %v388_v6 = vshll.u32 %v4530_v28, 16  ;;  %v1789_v30 = vrot.slane %v4459_v36, 1  ;;  %v4134_v63 = vld [vmem:[%s4344_s9 + $0x10] sm:$0xff]  }
  0x3c   : > { %v383_v24 = vsel %vm275_vm1, %v378_v7, %v382_v1  ;;  %v1784_v8 = vsel %vm766_vm3, %v1781_v44, %v1783_v53  ;;  %v1786_v5 = vsel %vm766_vm3, %v1783_v53, %v1785_v15  ;;  %v839_v37 = vsel %vm435_vm0, %v4393_v39, 0  ;;  %v4600_v44 = vld [vmem:[%s4344_s9 + $0x60] sm:$0xff]   ;;  %v4654_v53 = vld [vmem:[%s5066_s1 + $0x10] sm:$0x3] }
  0x3d   : > { %3568 = vmatmul.mubr.msk.bf16.gmra.mrb[12].mxu1 %vm392_vm2, %v343_v22  ;;  %v767_v22 = vrot.slane %v3249_v12, 1  ;;  %v386_v13 = vor.u32 %v384_v16, %v382_v1  ;;  %v390_v26 = vrot.slane %v388_v6, 1  ;;  %v1797_v39 = vrot.slane %v4600_v44, 1  ;;  %v4135_v1 = vld [vmem:[%s4344_s9 + $0x18] sm:$0xff]   ;;  %v4136_v7 = vld [vmem:[%s4344_s9 + $0x20] sm:$0xff]   ;;  %v4137_v12 = vld [vmem:[%s4344_s9 + $0x28] sm:$0xff]  }
  0x3e   : > { %3571 = vmatprep.mubr.msk.bf16.mxu1 %vm392_vm2, %v351_v27  ;;  %3688 = vmatmul.mubr.msk.bf16.gmra.mrb[12].mxu0 %vm392_vm2, %v1503_v31  ;;  %v1787_v27 = vrot.slane %v4446_v23, 1  ;;  %v1791_v23 = vrot.slane %v4475_v50, 1  ;;  %v1801_v55 = vrot.slane %v4617_v51, 1  ;;  %v2604_v11 = vsel %vm435_vm0, %v4540_v61, 0  ;;  %v4141_v16 = vld [vmem:[%s4344_s9 + $0x40] sm:$0xff]  }
  0x3f   : > { %3705 = vmatprep.mubr.msk.bf16.mxu0 %vm392_vm2, %v1778_v18  ;;  %v4562_v52 = vsel %vm766_vm3, %v767_v22, %v768_v56  ;;  %v391_v29 = vsel %vm275_vm1, %v386_v13, %v390_v26  ;;  %v4579_v18 = vld [vmem:[%s4344_s9 + $0x50] sm:$0xff]   ;;  %v4624_v56 = vld [vmem:[%s4344_s9 + $0x78] ss:$0 sps:$4 sm:$0x11]   ;;  %v780_v26 = vrot.slane %v4450_v25, 1 }
  0x40   : > { %v1788_v31 = vsel %vm766_vm3, %v1785_v15, %v1787_v27  ;;  %v1790_v33 = vsel %vm766_vm3, %v1787_v27, %v1789_v30  ;;  %v1793_v36 = vrot.slane %v4579_v18, 1  ;;  %v1792_v40 = vsel %vm766_vm3, %v1789_v30, %v1791_v23  ;;  %v4139_v15 = vld [vmem:[%s4344_s9 + $0x38] sm:$0xff]  }
  0x41   : > { %v1803_v60 = vrot.slane %v4624_v56, 1 }
  0x42   : > { %v1794_v43 = vsel %vm766_vm3, %v1791_v23, %v1793_v36 }
  0x45   : > { %3572 = vmatmul.mubr.msk.bf16.gmra.mrb[16].mxu1 %vm392_vm2, %v359_v47 }
  0x46   : > { %3575 = vmatprep.mubr.msk.bf16.mxu1 %vm392_vm2, %v367_v54  ;;  %3706 = vmatmul.mubr.msk.bf16.vlgmr.msra.gmra.mrb[0].mxu0 %vm392_vm2, %v1780_v34  ;;  %v1799_v54 = vrot.slane %v4608_v45, 1 }
  0x47   : > { %3734 = vmatpush3.bf16.msra.mxu0 %v2166_v59  ;;  %3709 = vmatprep.mubr.msk.bf16.mxu0 %vm392_vm2, %v1782_v62  ;;  %v1804_v62 = vsel %vm766_vm3, %v1801_v55, %v1803_v60 }
  0x48   : > { %4057 = vmatprep.subr.msk.bf16.mxu0 %vm435_vm0, %v4540_v61  ;;  %v1800_v34 = vsel %vm766_vm3, %v1797_v39, %v1799_v54  ;;  %v1802_v59 = vsel %vm766_vm3, %v1799_v54, %v1801_v55  ;;  %v4138_v61 = vld [vmem:[%s4344_s9 + $0x30] sm:$0xff]  }
  0x4d   : > { %3576 = vmatmul.mubr.msk.bf16.gmra.mrb[20].mxu1 %vm392_vm2, %v375_v20  ;;  %v772_v20 = vrot.slane %v4382_v32, 1 }
  0x4e   : > { %3579 = vmatprep.mubr.msk.bf16.mxu1 %vm392_vm2, %v383_v24  ;;  %3710 = vmatmul.mubr.msk.bf16.gmra.mrb[4].mxu0 %vm392_vm2, %v1784_v8  ;;  %v4142_v24 = vld [vmem:[%s4344_s9 + $0x48] sm:$0xff]   ;;  %v776_v8 = vrot.slane %v4417_v58, 1 }
  0x4f   : > { %3713 = vmatprep.mubr.msk.bf16.mxu0 %vm392_vm2, %v1786_v5  ;;  %v773_v6 = vsel %vm766_vm3, %v770_v57, %v772_v20  ;;  %v4696_v5 = vld [vmem:[%s4344_s9 + $0x14] sm:$0xf] }
  0x55   : > { %3580 = vmatmul.mubr.msk.bf16.gmra.mrb[24].mxu1 %vm392_vm2, %v391_v29  ;;  %v4709_v29 = vld [vmem:[%s4344_s9 + $0x18] sm:$0xff]  }
  0x56   : > { %3585 = vmatprep.mubr.msk.bf16.mxu1 %vm392_vm2, %v4354_v9  ;;  %3714 = vmatmul.mubr.msk.bf16.gmra.mrb[8].mxu0 %vm392_vm2, %v1788_v31  ;;  %v3264_v9 = vld [vmem:[%s5066_s1 + $0x6] sm:$0x3] }
  0x57   : > { %3717 = vmatprep.mubr.msk.bf16.mxu0 %vm392_vm2, %v1790_v33  ;;  %v1157_v22 = vsel %vm435_vm0, %v3264_v9, 0  ;;  %v4146_v33 = vld [vmem:[%s4344_s9 + $0x68] sm:$0xff]  }
  0x5d   : > { %3586 = vmatmul.mubr.msk.bf16.vlgmr.msra.gmra.mrb[0].mxu1 %vm392_vm2, %v4357_v10  ;;  %v1795_v10 = vrot.slane %v4594_v42, 1 }
  0x5e   : > { %3589 = vmatprep.mubr.msk.bf16.mxu1 %vm392_vm2, %v4372_v19  ;;  %3614 = vmatpush3.bf16.msra.mxu1 %v839_v37  ;;  %v2453_v37 = vshll.u32 %v4709_v29, 16 }
  0x5f   : > { %4052 = vmatprep.subr.msk.bf16.mxu1 %vm435_vm0, %v3264_v9  ;;  %3718 = vmatmul.mubr.msk.bf16.gmra.mrb[12].mxu0 %vm392_vm2, %v1792_v40  ;;  %v1796_v47 = vsel %vm766_vm3, %v1793_v36, %v1795_v10  ;;  %v1798_v49 = vsel %vm766_vm3, %v1795_v10, %v1797_v39  ;;  %v784_v9 = vrot.slane %v4470_v46, 1  ;;  %v4721_v40 = vld [vmem:[%s4344_s9 + $0x20] sm:$0xff]  }
  0x60   : > { %3721 = vmatprep.mubr.msk.bf16.mxu0 %vm392_vm2, %v1794_v43  ;;  %v2455_v39 = vrot.slane %v2453_v37, 1  ;;  %v2461_v54 = vshll.u32 %v4721_v40, 16  ;;  %v4156_v37 = vld [vmem:[%s4344_s9 + $0x8] sm:$0xff]  }
  0x65   : > { %3590 = vmatmul.mubr.msk.bf16.gmra.mrb[4].mxu1 %vm392_vm2, %v4382_v32  ;;  %v774_v32 = vrot.slane %v4401_v48, 1 }
  0x66   : > { %3593 = vmatprep.mubr.msk.bf16.mxu1 %vm392_vm2, %v4401_v48  ;;  %v4144_v48 = vld [vmem:[%s4344_s9 + $0x58] sm:$0xff]  }
  0x67   : > { %3722 = vmatmul.mubr.msk.bf16.gmra.mrb[16].mxu0 %vm392_vm2, %v1796_v47  ;;  %v775_v19 = vsel %vm766_vm3, %v772_v20, %v774_v32  ;;  %v777_v57 = vsel %vm766_vm3, %v774_v32, %v776_v8  ;;  %v4726_v47 = vld [vmem:[%s4344_s9 + $0x28] sm:$0xff]   ;;  %v2857_v20 = vsel %vm435_vm0, %v4654_v53, 0 }
  0x68   : > { %3725 = vmatprep.mubr.msk.bf16.mxu0 %vm392_vm2, %v1798_v49  ;;  %v4148_v49 = vld [vmem:[%s4344_s9 + $0x78] sm:$0xff]   ;;  %v2469_v60 = vshll.u32 %v4726_v47, 16 }
  0x6d   : > { %3594 = vmatmul.mubr.msk.bf16.gmra.mrb[8].mxu1 %vm392_vm2, %v4417_v58  ;;  %v4145_v58 = vld [vmem:[%s4344_s9 + $0x60] sm:$0xff]  }
  0x6e   : > { %3597 = vmatprep.mubr.msk.bf16.mxu1 %vm392_vm2, %v4437_v14 }
  0x6f   : > { %3726 = vmatmul.mubr.msk.bf16.gmra.mrb[20].mxu0 %vm392_vm2, %v1800_v34  ;;  %v786_v34 = vrot.slane %v4488_v4, 1 }
  0x70   : > { %3729 = vmatprep.mubr.msk.bf16.mxu0 %vm392_vm2, %v1802_v59  ;;  %v2465_v59 = vshrl.u32 %v4721_v40, 16 }
  0x75   : > { %3598 = vmatmul.mubr.msk.bf16.gmra.mrb[12].mxu1 %vm392_vm2, %v4450_v25  ;;  %v782_v25 = vrot.slane %v4465_v41, 1 }
  0x76   : > { %3601 = vmatprep.mubr.msk.bf16.mxu1 %vm392_vm2, %v4465_v41 }
  0x77   : > { %3730 = vmatmul.mubr.msk.bf16.gmra.mrb[24].mxu0 %vm392_vm2, %v1804_v62  ;;  %v783_v43 = vsel %vm766_vm3, %v780_v26, %v782_v25  ;;  %v785_v41 = vsel %vm766_vm3, %v782_v25, %v784_v9  ;;  %v788_v62 = vrot.slane %v4494_v17, 1  ;;  %v4782_v25 = vld [vmem:[%s4344_s9 + $0x50] sm:$0xff]  }
  0x78   : > { %3735 = vmatprep.mubr.msk.bf16.mxu0 %vm392_vm2, %v4134_v63  ;;  %v2463_v63 = vrot.slane %v2461_v54, 1  ;;  %v2513_v54 = vshrl.u32 %v4782_v25, 16 }
  0x7d   : > { %3602 = vmatmul.mubr.msk.bf16.gmra.mrb[16].mxu1 %vm392_vm2, %v4470_v46  ;;  %v2457_v46 = vshrl.u32 %v4709_v29, 16 }
  0x7e   : > { %3605 = vmatprep.mubr.msk.bf16.mxu1 %vm392_vm2, %v4488_v4  ;;  %v4746_v4 = vld [vmem:[%s4344_s9 + $0x38] sm:$0xff]  }
  0x7f   : > { %3736 = vmatmul.mubr.msk.bf16.vlgmr.msra.gmra.mrb[0].mxu0 %vm392_vm2, %v4135_v1  ;;  %v4741_v1 = vld [vmem:[%s4344_s9 + $0x30] sm:$0xff]   ;;  %v2485_v32 = vshll.u32 %v4746_v4, 16 }
  0x80   : > { %3764 = vmatpush3.bf16.msra.mxu0 %v2604_v11  ;;  %3739 = vmatprep.mubr.msk.bf16.mxu0 %vm392_vm2, %v4136_v7  ;;  %v2459_v7 = vor.u32 %v2457_v46, %v2455_v39  ;;  %v787_v11 = vsel %vm766_vm3, %v784_v9, %v786_v34 }
  0x81   : > { %4058 = vmatprep.subr.msk.bf16.mxu0 %vm435_vm0, %v4654_v53 }
  0x85   : > { %3606 = vmatmul.mubr.msk.bf16.gmra.mrb[20].mxu1 %vm392_vm2, %v4494_v17  ;;  %v2464_v17 = vsel %vm275_vm1, %v2459_v7, %v2463_v63 }
  0x86   : > { %3609 = vmatprep.mubr.msk.bf16.mxu1 %vm392_vm2, %v4511_v35 }
  0x87   : > { %3740 = vmatmul.mubr.msk.bf16.gmra.mrb[4].mxu0 %vm392_vm2, %v4137_v12  ;;  %v2467_v12 = vor.u32 %v2465_v59, %v2463_v63  ;;  %v4158_v59 = vld [vmem:[%s4344_s9 + $0x10] sm:$0xff]  }
  0x88   : > { %3743 = vmatprep.mubr.msk.bf16.mxu0 %vm392_vm2, %v4138_v61  ;;  %v2471_v61 = vrot.slane %v2469_v60, 1 }
  0x8d   : > { %3610 = vmatmul.mubr.msk.bf16.gmra.mrb[24].mxu1 %vm392_vm2, %v4516_v38 }
  0x8e   : > { %3615 = vmatprep.mubr.msk.bf16.mxu1 %vm392_vm2, %v4562_v52  ;;  %v4143_v52 = vld [vmem:[%s4344_s9 + $0x50] sm:$0xff]  }
  0x8f   : > { %3744 = vmatmul.mubr.msk.bf16.gmra.mrb[8].mxu0 %vm392_vm2, %v4139_v15  ;;  %v789_v15 = vsel %vm766_vm3, %v786_v34, %v788_v62  ;;  %v4800_v34 = vld [vmem:[%s4344_s9 + $0x60] sm:$0xff]  }
  0x90   : > { %3747 = vmatprep.mubr.msk.bf16.mxu0 %vm392_vm2, %v4141_v16  ;;  %v2477_v16 = vshll.u32 %v4741_v1, 16 }
  0x95   : > { %3616 = vmatmul.mubr.msk.bf16.vlgmr.msra.gmra.mrb[0].mxu1 %vm392_vm2, %v4547_v3  ;;  %v2341_v3 = vld [vmem:[%s4344_s9 + $0x10] sm:$0xf] }
  0x96   : > { %3619 = vmatprep.mubr.msk.bf16.mxu1 %vm392_vm2, %v773_v6  ;;  %3644 = vmatpush3.bf16.msra.mxu1 %v1157_v22  ;;  %v3369_v13 = vcombine.low %v2341_v3, %v4696_v5  ;;  %v2473_v6 = vshrl.u32 %v4726_v47, 16  ;;  %v2472_v22 = vsel %vm275_vm1, %v2467_v12, %v2471_v61  ;;  %v2525_v12 = vshll.u32 %v4800_v34, 16 }
  0x97   : > { %4054 = vmatprep.subr.msk.bf16.mxu1 %vm435_vm0, %v4317_v0  ;;  %3748 = vmatmul.mubr.msk.bf16.gmra.mrb[12].mxu0 %vm392_vm2, %v4142_v24  ;;  %v778_v0 = vrot.slane %v4437_v14, 1  ;;  %v4147_v14 = vld [vmem:[%s4344_s9 + $0x70] sm:$0xff]   ;;  %v790_v24 = vrot.slane %v4511_v35, 1  ;;  %v2487_v35 = vrot.slane %v2485_v32, 1  ;;  %v4164_v32 = vld [vmem:[%s4344_s9 + $0x28] sm:$0xff]  }
  0x98   : > { %3751 = vmatprep.mubr.msk.bf16.mxu0 %vm392_vm2, %v4143_v52  ;;  %v2448_v30 = vshll.u32 %v3369_v13, 16  ;;  %v2446_v23 = vshrl.u32 %v3369_v13, 16  ;;  %v2481_v52 = vshrl.u32 %v4741_v1, 16  ;;  %v2475_v53 = vor.u32 %v2473_v6, %v2471_v61 }
  0x99   : > { %v779_v27 = vsel %vm766_vm3, %v776_v8, %v778_v0  ;;  %v781_v31 = vsel %vm766_vm3, %v778_v0, %v780_v26  ;;  %v792_v8 = vrot.slane %v4516_v38, 1  ;;  %v791_v3 = vsel %vm766_vm3, %v788_v62, %v790_v24  ;;  %v4160_v62 = vld [vmem:[%s4344_s9 + $0x18] sm:$0xff]  }
  0x9a   : > { %v2450_v36 = vrot.slane %v2448_v30, 1  ;;  %v2489_v26 = vshrl.u32 %v4746_v4, 16  ;;  %v794_v30 = vrot.slane %v4530_v28, 1  ;;  %v4788_v28 = vld [vmem:[%s4344_s9 + $0x58] sm:$0xff]   ;;  %v2527_v6 = vrot.slane %v2525_v12, 1 }
  0x9b   : > { %v793_v0 = vsel %vm766_vm3, %v790_v24, %v792_v8  ;;  %v2517_v46 = vshll.u32 %v4788_v28, 16  ;;  %v4162_v24 = vld [vmem:[%s4344_s9 + $0x20] sm:$0xff]  }
  0x9c   : > { %v2451_v10 = vor.u32 %v2450_v36, %v2446_v23  ;;  %v2491_v23 = vor.u32 %v2489_v26, %v2487_v35  ;;  %v795_v36 = vsel %vm766_vm3, %v792_v8, %v794_v30  ;;  %v4166_v26 = vld [vmem:[%s4344_s9 + $0x30] sm:$0xff]   ;;  %v4839_v30 = vld [vmem:[%s4344_s9 + $0x80] ss:$0 sps:$4 sm:$0x11]  }
  0x9d   : > { %3620 = vmatmul.mubr.msk.bf16.gmra.mrb[4].mxu1 %vm392_vm2, %v775_v19  ;;  %v2479_v19 = vrot.slane %v2477_v16, 1  ;;  %v2519_v7 = vrot.slane %v2517_v46, 1 }
  0x9e   : > { %3623 = vmatprep.mubr.msk.bf16.mxu1 %vm392_vm2, %v777_v57  ;;  %v2456_v55 = vsel %vm275_vm1, %v2451_v10, %v2455_v39  ;;  %v4763_v57 = vld [vmem:[%s4344_s9 + $0x40] sm:$0xff]   ;;  %v2509_v10 = vshll.u32 %v4782_v25, 16 }
  0x9f   : > { %3752 = vmatmul.mubr.msk.bf16.gmra.mrb[16].mxu0 %vm392_vm2, %v4144_v48  ;;  %v2483_v48 = vor.u32 %v2481_v52, %v2479_v19  ;;  %v2493_v38 = vshll.u32 %v4763_v57, 16  ;;  %v2480_v13 = vsel %vm275_vm1, %v2475_v53, %v2479_v19 }
  0xa0   : > { %3755 = vmatprep.mubr.msk.bf16.mxu0 %vm392_vm2, %v4145_v58  ;;  %v4768_v58 = vld [vmem:[%s4344_s9 + $0x48] sm:$0xff]  }
  0xa5   : > { %3624 = vmatmul.mubr.msk.bf16.gmra.mrb[8].mxu1 %vm392_vm2, %v779_v27  ;;  %v2488_v27 = vsel %vm275_vm1, %v2483_v48, %v2487_v35 }
  0xa6   : > { %3627 = vmatprep.mubr.msk.bf16.mxu1 %vm392_vm2, %v781_v31  ;;  %v2497_v31 = vshrl.u32 %v4763_v57, 16 }
  0xa7   : > { %3756 = vmatmul.mubr.msk.bf16.gmra.mrb[20].mxu0 %vm392_vm2, %v4146_v33  ;;  %v2501_v33 = vshll.u32 %v4768_v58, 16 }
  0xa8   : > { %3759 = vmatprep.mubr.msk.bf16.mxu0 %vm392_vm2, %v4147_v14  ;;  %v2495_v14 = vrot.slane %v2493_v38, 1 }
  0xaa   : > { %v2499_v9 = vor.u32 %v2497_v31, %v2495_v14  ;;  %v2496_v39 = vsel %vm275_vm1, %v2491_v23, %v2495_v14  ;;  %v4168_v31 = vld [vmem:[%s4344_s9 + $0x38] sm:$0xff]   ;;  %v2779_v23 = vld [vmem:[%s4344_s9 + $0x10] sm:$0xe] }
  0xad   : > { %3628 = vmatmul.mubr.msk.bf16.gmra.mrb[12].mxu1 %vm392_vm2, %v783_v43  ;;  %v2503_v43 = vrot.slane %v2501_v33, 1 }
  0xae   : > { %3631 = vmatprep.mubr.msk.bf16.mxu1 %vm392_vm2, %v785_v41  ;;  %v2505_v41 = vshrl.u32 %v4768_v58, 16 }
  0xaf   : > { %3760 = vmatmul.mubr.msk.bf16.gmra.mrb[24].mxu0 %vm392_vm2, %v4148_v49  ;;  %v2504_v49 = vsel %vm275_vm1, %v2499_v9, %v2503_v43  ;;  %v2557_v9 = vshll.u32 %v4839_v30, 16 }
  0xb0   : > { %3765 = vmatprep.mubr.msk.bf16.mxu0 %vm392_vm2, %v2456_v55  ;;  %v2511_v55 = vrot.slane %v2509_v10, 1  ;;  %v2507_v60 = vor.u32 %v2505_v41, %v2503_v43  ;;  %v3399_v10 = vcombine.low %v2779_v23, %v4696_v5 }
  0xb2   : > { %v2515_v63 = vor.u32 %v2513_v54, %v2511_v55  ;;  %v2512_v61 = vsel %vm275_vm1, %v2507_v60, %v2511_v55  ;;  %v4172_v54 = vld [vmem:[%s4344_s9 + $0x48] sm:$0xff]   ;;  %v2785_v46 = vrot.slane %v3399_v10, 1  ;;  %v2786_v55 = vrot.slane %v4709_v29, 1  ;;  %v4174_v60 = vld [vmem:[%s4344_s9 + $0x50] sm:$0xff]  }
  0xb3   : > { %v2790_v29 = vrot.slane %v4726_v47, 1  ;;  %v1504_v47 = vshrl.u32 %v4475_v50, 16  ;;  %v2796_v50 = vrot.slane %v4763_v57, 1  ;;  %v1548_v10 = vshll.u32 %v4624_v56, 16 }
  0xb4   : > { %v2520_v16 = vsel %vm275_vm1, %v2515_v63, %v2519_v7  ;;  %v2787_v5 = vsel %vm766_vm3, %v2785_v46, %v2786_v55  ;;  %v4175_v63 = vld [vmem:[%s4344_s9 + $0x58] sm:$0xff]  }
  0xb5   : > { %3632 = vmatmul.mubr.msk.bf16.gmra.mrb[16].mxu1 %vm392_vm2, %v787_v11  ;;  %v4806_v11 = vld [vmem:[%s4344_s9 + $0x68] sm:$0xff]  }
  0xb6   : > { %3635 = vmatprep.mubr.msk.bf16.mxu1 %vm392_vm2, %v789_v15  ;;  %v2521_v15 = vshrl.u32 %v4788_v28, 16  ;;  %v2537_v48 = vshrl.u32 %v4806_v11, 16 }
  0xb7   : > { %3766 = vmatmul.mubr.msk.bf16.vlgmr.msra.gmra.mrb[0].mxu0 %vm392_vm2, %v2464_v17  ;;  %v2529_v17 = vshrl.u32 %v4800_v34, 16 }
  0xb8   : > { %3794 = vmatpush3.bf16.msra.mxu0 %v2857_v20  ;;  %3769 = vmatprep.mubr.msk.bf16.mxu0 %vm392_vm2, %v2472_v22  ;;  %v2533_v20 = vshll.u32 %v4806_v11, 16  ;;  %v4819_v22 = vld [vmem:[%s4344_s9 + $0x70] sm:$0xff]   ;;  %v2523_v52 = vor.u32 %v2521_v15, %v2519_v7  ;;  %v2792_v15 = vrot.slane %v4741_v1, 1 }
  0xb9   : > { %v2531_v8 = vor.u32 %v2529_v17, %v2527_v6  ;;  %v2541_v53 = vshll.u32 %v4819_v22, 16  ;;  %v1508_v17 = vshll.u32 %v4579_v18, 16  ;;  %v4178_v1 = vld [vmem:[%s4344_s9 + $0x70] sm:$0xff]  }
  0xba   : > { %v2535_v19 = vrot.slane %v2533_v20, 1  ;;  %v2793_v20 = vsel %vm766_vm3, %v2790_v29, %v2792_v15 }
  0xbc   : > { %v2536_v35 = vsel %vm275_vm1, %v2531_v8, %v2535_v19  ;;  %v2798_v8 = vrot.slane %v4768_v58, 1  ;;  %v1532_v58 = vshll.u32 %v4608_v45, 16 }
  0xbd   : > { %3636 = vmatmul.mubr.msk.bf16.gmra.mrb[20].mxu1 %vm392_vm2, %v791_v3  ;;  %v2528_v3 = vsel %vm275_vm1, %v2523_v52, %v2527_v6  ;;  %v1510_v52 = vrot.slane %v1508_v17, 1 }
  0xbe   : > { %3639 = vmatprep.mubr.msk.bf16.mxu1 %vm392_vm2, %v793_v0  ;;  %v2545_v0 = vshrl.u32 %v4819_v22, 16  ;;  %v2799_v57 = vsel %vm766_vm3, %v2796_v50, %v2798_v8  ;;  %v1534_v23 = vrot.slane %v1532_v58, 1 }
  0xbf   : > { %3770 = vmatmul.mubr.msk.bf16.gmra.mrb[4].mxu0 %vm392_vm2, %v2480_v13  ;;  %v2543_v13 = vrot.slane %v2541_v53, 1  ;;  %v1520_v53 = vshrl.u32 %v4594_v42, 16 }
  0xc0   : > { %3773 = vmatprep.mubr.msk.bf16.mxu0 %vm392_vm2, %v2488_v27  ;;  %v2539_v27 = vor.u32 %v2537_v48, %v2535_v19 }
  0xc1   : > { %v2547_v33 = vor.u32 %v2545_v0, %v2543_v13 }
  0xc5   : > { %3640 = vmatmul.mubr.msk.bf16.gmra.mrb[24].mxu1 %vm392_vm2, %v795_v36  ;;  %v2544_v36 = vsel %vm275_vm1, %v2539_v27, %v2543_v13  ;;  %v2802_v13 = vrot.slane %v4788_v28, 1 }
  0xc6   : > { %3645 = vmatprep.mubr.msk.bf16.mxu1 %vm392_vm2, %v4156_v37 }
  0xc7   : > { %3774 = vmatmul.mubr.msk.bf16.gmra.mrb[8].mxu0 %vm392_vm2, %v2496_v39  ;;  %v4170_v39 = vld [vmem:[%s4344_s9 + $0x40] sm:$0xff]  }
  0xc8   : > { %3777 = vmatprep.mubr.msk.bf16.mxu0 %vm392_vm2, %v2504_v49  ;;  %v2559_v49 = vrot.slane %v2557_v9, 1  ;;  %v2806_v9 = vrot.slane %v4806_v11, 1 }
  0xcd   : > { %3646 = vmatmul.mubr.msk.bf16.vlgmr.msra.gmra.mrb[0].mxu1 %vm392_vm2, %v4158_v59 }
  0xce   : > { %3649 = vmatprep.mubr.msk.bf16.mxu1 %vm392_vm2, %v4160_v62  ;;  %3824 = vmatpush3.bf16.msra.mxu1 %v4328_v2  ;;  %v4825_v2 = vld [vmem:[%s4344_s9 + $0x78] sm:$0xff]   ;;  %v2788_v62 = vrot.slane %v4721_v40, 1  ;;  %v4177_v40 = vld [vmem:[%s4344_s9 + $0x68] sm:$0xff]  }
  0xcf   : > { %3778 = vmatmul.mubr.msk.bf16.gmra.mrb[12].mxu0 %vm392_vm2, %v2512_v61  ;;  %v2549_v38 = vshll.u32 %v4825_v2, 16  ;;  %v2553_v37 = vshrl.u32 %v4825_v2, 16  ;;  %v4176_v61 = vld [vmem:[%s4344_s9 + $0x60] sm:$0xff]   ;;  %v2810_v11 = vrot.slane %v4825_v2, 1 }
  0xd0   : > { %3781 = vmatprep.mubr.msk.bf16.mxu0 %vm392_vm2, %v2520_v16  ;;  %v2789_v7 = vsel %vm766_vm3, %v2786_v55, %v2788_v62  ;;  %v2791_v12 = vsel %vm766_vm3, %v2788_v62, %v2790_v29  ;;  %v2794_v16 = vrot.slane %v4746_v4, 1  ;;  %v1516_v4 = vshll.u32 %v4594_v42, 16 }
  0xd1   : > { %v2551_v14 = vrot.slane %v2549_v38, 1  ;;  %v2800_v42 = vrot.slane %v4782_v25, 1 }
  0xd2   : > { %v2795_v6 = vsel %vm766_vm3, %v2792_v15, %v2794_v16  ;;  %v1518_v48 = vrot.slane %v1516_v4, 1 }
  0xd3   : > { %v2552_v43 = vsel %vm275_vm1, %v2547_v33, %v2551_v14  ;;  %v2555_v41 = vor.u32 %v2553_v37, %v2551_v14  ;;  %v1540_v33 = vshll.u32 %v4617_v51, 16  ;;  %v2801_v14 = vsel %vm766_vm3, %v2798_v8, %v2800_v42 }
  0xd4   : > { %v1522_v0 = vor.u32 %v1520_v53, %v1518_v48  ;;  %v2803_v25 = vsel %vm766_vm3, %v2800_v42, %v2802_v13 }
  0xd5   : > { %3650 = vmatmul.mubr.msk.bf16.gmra.mrb[4].mxu1 %vm392_vm2, %v4162_v24  ;;  %v2560_v59 = vsel %vm275_vm1, %v2555_v41, %v2559_v49  ;;  %v1506_v24 = vor.u32 %v1504_v47, %v4498_v21  ;;  %v1524_v21 = vshll.u32 %v4600_v44, 16  ;;  %v1542_v28 = vrot.slane %v1540_v33, 1 }
  0xd6   : > { %3653 = vmatprep.mubr.msk.bf16.mxu1 %vm392_vm2, %v4164_v32  ;;  %v1512_v32 = vshrl.u32 %v4579_v18, 16 }
  0xd7   : > { %3782 = vmatmul.mubr.msk.bf16.gmra.mrb[16].mxu0 %vm392_vm2, %v2528_v3  ;;  %v1511_v19 = vsel %vm275_vm1, %v1506_v24, %v1510_v52  ;;  %v2797_v3 = vsel %vm766_vm3, %v2794_v16, %v2796_v50  ;;  %v1526_v18 = vrot.slane %v1524_v21, 1  ;;  %v4949_v24 = vld [vmem:[%s5067_s2] ss:$0 sm:$0xff] }
  0xd8   : > { %3785 = vmatprep.mubr.msk.bf16.mxu0 %vm392_vm2, %v2536_v35  ;;  %v1514_v35 = vor.u32 %v1512_v32, %v1510_v52 }
  0xd9   : > { %v1527_v27 = vsel %vm275_vm1, %v1522_v0, %v1526_v18 }
  0xda   : > { %v1519_v38 = vsel %vm275_vm1, %v1514_v35, %v1518_v48 }
  0xdd   : > { %3654 = vmatmul.mubr.msk.bf16.gmra.mrb[8].mxu1 %vm392_vm2, %v4166_v26  ;;  %v1528_v26 = vshrl.u32 %v4600_v44, 16  ;;  %v2804_v44 = vrot.slane %v4800_v34, 1  ;;  %v1550_v34 = vrot.slane %v1548_v10, 1 }
  0xde   : > { %3657 = vmatprep.mubr.msk.bf16.mxu1 %vm392_vm2, %v4168_v31  ;;  %v1536_v31 = vshrl.u32 %v4608_v45, 16 }
  0xdf   : > { %3786 = vmatmul.mubr.msk.bf16.gmra.mrb[20].mxu0 %vm392_vm2, %v2544_v36  ;;  %v1530_v36 = vor.u32 %v1528_v26, %v1526_v18  ;;  %v2805_v41 = vsel %vm766_vm3, %v2802_v13, %v2804_v44  ;;  %v2807_v49 = vsel %vm766_vm3, %v2804_v44, %v2806_v9 }
  0xe0   : > { %3789 = vmatprep.mubr.msk.bf16.mxu0 %vm392_vm2, %v2552_v43  ;;  %v1538_v37 = vor.u32 %v1536_v31, %v1534_v23  ;;  %v1544_v43 = vshrl.u32 %v4617_v51, 16  ;;  %v2808_v51 = vrot.slane %v4819_v22, 1 }
  0xe1   : > { %v1535_v45 = vsel %vm275_vm1, %v1530_v36, %v1534_v23 }
  0xe2   : > { %v2809_v46 = vsel %vm766_vm3, %v2806_v9, %v2808_v51  ;;  %v2811_v55 = vsel %vm766_vm3, %v2808_v51, %v2810_v11 }
  0xe5   : > { %3658 = vmatmul.mubr.msk.bf16.gmra.mrb[12].mxu1 %vm392_vm2, %v4170_v39  ;;  %v1543_v39 = vsel %vm275_vm1, %v1538_v37, %v1542_v28 }
  0xe6   : > { %3661 = vmatprep.mubr.msk.bf16.mxu1 %vm392_vm2, %v4172_v54  ;;  %v1546_v54 = vor.u32 %v1544_v43, %v1542_v28 }
  0xe7   : > { %3790 = vmatmul.mubr.msk.bf16.gmra.mrb[24].mxu0 %vm392_vm2, %v2560_v59  ;;  %v2812_v59 = vrot.slane %v4839_v30, 1 }
  0xe8   : > { %3795 = vmatprep.mubr.msk.bf16.mxu0 %vm392_vm2, %v2787_v5  ;;  %v1551_v56 = vsel %vm275_vm1, %v1546_v54, %v1550_v34 }
  0xe9   : > { %v2813_v5 = vsel %vm766_vm3, %v2810_v11, %v2812_v59 }
  0xed   : > { %3662 = vmatmul.mubr.msk.bf16.gmra.mrb[16].mxu1 %vm392_vm2, %v4174_v60 }
  0xee   : > { %3665 = vmatprep.mubr.msk.bf16.mxu1 %vm392_vm2, %v4175_v63 }
  0xef   : > { %3796 = vmatmul.mubr.msk.bf16.vlgmr.msra.gmra.mrb[0].mxu0 %vm392_vm2, %v2789_v7 }
  0xf0   : > { %3799 = vmatprep.mubr.msk.bf16.mxu0 %vm392_vm2, %v2791_v12 }
  0xf5   : > { %3666 = vmatmul.mubr.msk.bf16.gmra.mrb[20].mxu1 %vm392_vm2, %v4176_v61 }
  0xf6   : > { %3669 = vmatprep.mubr.msk.bf16.mxu1 %vm392_vm2, %v4177_v40 }
  0xf7   : > { %3800 = vmatmul.mubr.msk.bf16.gmra.mrb[4].mxu0 %vm392_vm2, %v2793_v20 }
  0xf8   : > { %3803 = vmatprep.mubr.msk.bf16.mxu0 %vm392_vm2, %v2795_v6 }
  0xfd   : > { %3670 = vmatmul.mubr.msk.bf16.gmra.mrb[24].mxu1 %vm392_vm2, %v4178_v1 }
  0xfe   : > { %3691 = vmatprep.mubr.msk.bf16.mxu1 %vm392_vm2, %v1511_v19 }
  0xff   : > { %3804 = vmatmul.mubr.msk.bf16.gmra.mrb[8].mxu0 %vm392_vm2, %v2797_v3 }
 0x100   : > { %3807 = vmatprep.mubr.msk.bf16.mxu0 %vm392_vm2, %v2799_v57 }
 0x105   : > { %3692 = vmatmul.mubr.msk.bf16.vlgmr.msra.gmra.mrb[16].mxu1 %vm392_vm2, %v1519_v38 }
 0x106   : > { %3695 = vmatprep.mubr.msk.bf16.mxu1 %vm392_vm2, %v1527_v27 }
 0x107   : > { %3808 = vmatmul.mubr.msk.bf16.gmra.mrb[12].mxu0 %vm392_vm2, %v2801_v14 }
 0x108   : > { %3811 = vmatprep.mubr.msk.bf16.mxu0 %vm392_vm2, %v2803_v25 }
 0x10d   : > { %3696 = vmatmul.mubr.msk.bf16.gmra.mrb[20].mxu1 %vm392_vm2, %v1535_v45 }
 0x10e   : > { %3699 = vmatprep.mubr.msk.bf16.mxu1 %vm392_vm2, %v1543_v39 }
 0x10f   : > { %3812 = vmatmul.mubr.msk.bf16.gmra.mrb[16].mxu0 %vm392_vm2, %v2805_v41 }
 0x110   : > { %3815 = vmatprep.mubr.msk.bf16.mxu0 %vm392_vm2, %v2807_v49 }
 0x115   : > { %3700 = vmatmul.mubr.msk.bf16.gmra.mrb[24].mxu1 %vm392_vm2, %v1551_v56 }
 0x117   : > { %3816 = vmatmul.mubr.msk.bf16.gmra.mrb[20].mxu0 %vm392_vm2, %v2809_v46 }
 0x118   : > { %3819 = vmatprep.mubr.msk.bf16.mxu0 %vm392_vm2, %v2811_v55 }
 0x11f   : > { %3820 = vmatmul.mubr.msk.bf16.gmra.mrb[24].mxu0 %vm392_vm2, %v2813_v5 }
 0x1a0   : > { %v3647_v22 = vpop.f32.mrb[0].mxu1 }
 0x1a1   : > { %v1193_v60 = vpop.f32.mrb[1].mxu1 }
 0x1a2   : > { %v3648_v2 = vpop.f32.mrb[2].mxu1 }
 0x1a3   : > { %v1196_v62 = vpop.f32.mrb[3].mxu1 }
 0x1a8   : > { %v3651_v63 = vpop.f32.mrb[4].mxu1 }
 0x1a9   : > { %v1209_v29 = vpop.f32.mrb[5].mxu1 }
 0x1aa   : > { %v3652_v7 = vpop.f32.mrb[6].mxu1 }
 0x1ab   : > { %v1212_v12 = vpop.f32.mrb[7].mxu1 }
 0x1b0   : > { %v3655_v61 = vpop.f32.mrb[8].mxu1 }
 0x1b1   : > { %v1225_v15 = vpop.f32.mrb[9].mxu1 }
 0x1b2   : > { %v3656_v40 = vpop.f32.mrb[10].mxu1 }
 0x1b3   : > { %v1228_v16 = vpop.f32.mrb[11].mxu1 }
 0x1b8   : > { %v4935_v47 = vpop.f32.mrb[12].mxu1 }
 0x1b9   : > { %v4937_v30 = vpop.f32.mrb[13].mxu1 }
 0x1ba   : > { %v4939_v17 = vpop.f32.mrb[14].mxu1 }
 0x1bb   : > { %v4941_v20 = vpop.f32.mrb[15].mxu1 }
 0x1c2   : > { %v3797_v6 = vpop.f32.mrb[0].mxu0 }
 0x1c3   : > { %v3825_v52 = vadd.f32 %v3797_v6, %v3647_v22  ;;  %v2893_v1 = vpop.f32.mrb[1].mxu0 }
 0x1c4   : > { %v3826_v50 = vadd.f32 %v2893_v1, %v1193_v60  ;;  %v3798_v4 = vpop.f32.mrb[2].mxu0 }
 0x1c5   : > { %v3041_v32 = vadd.f32 %v3825_v52, %v4949_v24  ;;  %v3827_v8 = vadd.f32 %v3798_v4, %v3648_v2  ;;  %v2896_v19 = vpop.f32.mrb[3].mxu0 }
 0x1c6   : > { %v3039_v53 = vadd.f32 %v3826_v50, %v4949_v24  ;;  %v3828_v21 = vadd.f32 %v2896_v19, %v1196_v62 }
 0x1c7   : > { %v3069_v3 = vmax.f32 %v3041_v32, 0.0  ;;  %v3042_v48 = vadd.f32 %v3827_v8, %v4949_v24 }
 0x1c8   : > { %v3067_v35 = vmax.f32 %v3039_v53, 0.0  ;;  %v3040_v57 = vadd.f32 %v3828_v21, %v4949_v24 }
 0x1c9   : > { %3097 = vst [vmem:[%s4955_s6 + $0x10] sm:$0xff] %v3069_v3  ;;  %v3070_v0 = vmax.f32 %v3042_v48, 0.0 }
 0x1ca   : > { %3095 = vst [vmem:[%s4955_s6] sm:$0xff] %v3067_v35  ;;  %v3068_v18 = vmax.f32 %v3040_v57, 0.0  ;;  %v3801_v42 = vpop.f32.mrb[4].mxu0 }
 0x1cb   : > { %3098 = vst [vmem:[%s4955_s6 + $0x18] sm:$0xff] %v3070_v0  ;;  %v3829_v58 = vadd.f32 %v3801_v42, %v3651_v63  ;;  %v2909_v38 = vpop.f32.mrb[5].mxu0 }
 0x1cc   : > { %3096 = vst [vmem:[%s4955_s6 + $0x8] sm:$0xff] %v3068_v18  ;;  %v3830_v13 = vadd.f32 %v2909_v38, %v1209_v29  ;;  %v3802_v26 = vpop.f32.mrb[6].mxu0 }
 0x1cd   : > { %v3045_v27 = vadd.f32 %v3829_v58, %v4949_v24  ;;  %v3831_v31 = vadd.f32 %v3802_v26, %v3652_v7  ;;  %v2912_v33 = vpop.f32.mrb[7].mxu0 }
 0x1ce   : > { %v3043_v14 = vadd.f32 %v3830_v13, %v4949_v24  ;;  %v3832_v23 = vadd.f32 %v2912_v33, %v1212_v12 }
 0x1cf   : > { %v3073_v25 = vmax.f32 %v3045_v27, 0.0  ;;  %v3046_v36 = vadd.f32 %v3831_v31, %v4949_v24 }
 0x1d0   : > { %v3071_v37 = vmax.f32 %v3043_v14, 0.0  ;;  %v3044_v28 = vadd.f32 %v3832_v23, %v4949_v24 }
 0x1d1   : > { %3101 = vst [vmem:[%s4955_s6 + $0x30] sm:$0xff] %v3073_v25  ;;  %v3074_v44 = vmax.f32 %v3046_v36, 0.0 }
 0x1d2   : > { %3099 = vst [vmem:[%s4955_s6 + $0x20] sm:$0xff] %v3071_v37  ;;  %v3072_v45 = vmax.f32 %v3044_v28, 0.0  ;;  %v3805_v9 = vpop.f32.mrb[8].mxu0 }
 0x1d3   : > { %3102 = vst [vmem:[%s4955_s6 + $0x38] sm:$0xff] %v3074_v44  ;;  %v3833_v43 = vadd.f32 %v3805_v9, %v3655_v61  ;;  %v2925_v10 = vpop.f32.mrb[9].mxu0 }
 0x1d4   : > { %3100 = vst [vmem:[%s4955_s6 + $0x28] sm:$0xff] %v3072_v45  ;;  %v3834_v39 = vadd.f32 %v2925_v10, %v1225_v15  ;;  %v3806_v41 = vpop.f32.mrb[10].mxu0 }
 0x1d5   : > { %v3049_v49 = vadd.f32 %v3833_v43, %v4949_v24  ;;  %v3835_v54 = vadd.f32 %v3806_v41, %v3656_v40  ;;  %v2928_v34 = vpop.f32.mrb[11].mxu0 }
 0x1d6   : > { %v3047_v51 = vadd.f32 %v3834_v39, %v4949_v24  ;;  %v3836_v56 = vadd.f32 %v2928_v34, %v1228_v16 }
 0x1d7   : > { %v3077_v11 = vmax.f32 %v3049_v49, 0.0  ;;  %v3050_v46 = vadd.f32 %v3835_v54, %v4949_v24 }
 0x1d8   : > { %v3693_v55 = vpop.f32.mrb[16].mxu1  ;;  %v3075_v59 = vmax.f32 %v3047_v51, 0.0  ;;  %v3048_v5 = vadd.f32 %v3836_v56, %v4949_v24 }
 0x1d9   : > { %v1695_v22 = vpop.f32.mrb[17].mxu1  ;;  %3105 = vst [vmem:[%s4955_s6 + $0x50] sm:$0xff] %v3077_v11  ;;  %v3078_v60 = vmax.f32 %v3050_v46, 0.0 }
 0x1da   : > { %v3694_v2 = vpop.f32.mrb[18].mxu1  ;;  %3103 = vst [vmem:[%s4955_s6 + $0x40] sm:$0xff] %v3075_v59  ;;  %v3076_v62 = vmax.f32 %v3048_v5, 0.0  ;;  %v3809_v63 = vpop.f32.mrb[12].mxu0 }
 0x1db   : > { %v1698_v29 = vpop.f32.mrb[19].mxu1  ;;  %3106 = vst [vmem:[%s4955_s6 + $0x58] sm:$0xff] %v3078_v60  ;;  %v3837_v7 = vadd.f32 %v3809_v63, %v4935_v47  ;;  %v2941_v12 = vpop.f32.mrb[13].mxu0 }
 0x1dc   : > { %3104 = vst [vmem:[%s4955_s6 + $0x48] sm:$0xff] %v3076_v62  ;;  %v3838_v61 = vadd.f32 %v2941_v12, %v4937_v30  ;;  %v3810_v15 = vpop.f32.mrb[14].mxu0 }
 0x1dd   : > { %v3053_v40 = vadd.f32 %v3837_v7, %v4949_v24  ;;  %v3839_v16 = vadd.f32 %v3810_v15, %v4939_v17  ;;  %v2944_v6 = vpop.f32.mrb[15].mxu0 }
 0x1de   : > { %v3051_v52 = vadd.f32 %v3838_v61, %v4949_v24  ;;  %v3840_v1 = vadd.f32 %v2944_v6, %v4941_v20 }
 0x1df   : > { %v3081_v50 = vmax.f32 %v3053_v40, 0.0  ;;  %v3054_v47 = vadd.f32 %v3839_v16, %v4949_v24 }
 0x1e0   : > { %v3697_v4 = vpop.f32.mrb[20].mxu1  ;;  %v3079_v32 = vmax.f32 %v3051_v52, 0.0  ;;  %v3052_v30 = vadd.f32 %v3840_v1, %v4949_v24 }
 0x1e1   : > { %v1711_v8 = vpop.f32.mrb[21].mxu1  ;;  %3109 = vst [vmem:[%s4955_s6 + $0x70] sm:$0xff] %v3081_v50  ;;  %v3082_v19 = vmax.f32 %v3054_v47, 0.0 }
 0x1e2   : > { %v3698_v53 = vpop.f32.mrb[22].mxu1  ;;  %3107 = vst [vmem:[%s4955_s6 + $0x60] sm:$0xff] %v3079_v32  ;;  %v3080_v17 = vmax.f32 %v3052_v30, 0.0  ;;  %v3813_v21 = vpop.f32.mrb[16].mxu0 }
 0x1e3   : > { %v1714_v3 = vpop.f32.mrb[23].mxu1  ;;  %3110 = vst [vmem:[%s4955_s6 + $0x78] sm:$0xff] %v3082_v19  ;;  %v3841_v48 = vadd.f32 %v3813_v21, %v3693_v55  ;;  %v2957_v20 = vpop.f32.mrb[17].mxu0 }
 0x1e4   : > { %3108 = vst [vmem:[%s4955_s6 + $0x68] sm:$0xff] %v3080_v17  ;;  %v3842_v35 = vadd.f32 %v2957_v20, %v1695_v22  ;;  %v3814_v57 = vpop.f32.mrb[18].mxu0 }
 0x1e5   : > { %v3057_v0 = vadd.f32 %v3841_v48, %v4949_v24  ;;  %v3843_v18 = vadd.f32 %v3814_v57, %v3694_v2  ;;  %v2960_v42 = vpop.f32.mrb[19].mxu0 }
 0x1e6   : > { %v3055_v58 = vadd.f32 %v3842_v35, %v4949_v24  ;;  %v3844_v38 = vadd.f32 %v2960_v42, %v1698_v29 }
 0x1e7   : > { %v3085_v13 = vmax.f32 %v3057_v0, 0.0  ;;  %v3058_v26 = vadd.f32 %v3843_v18, %v4949_v24 }
 0x1e8   : > { %v3701_v27 = vpop.f32.mrb[24].mxu1  ;;  %v3083_v31 = vmax.f32 %v3055_v58, 0.0  ;;  %v3056_v33 = vadd.f32 %v3844_v38, %v4949_v24 }
 0x1e9   : > { %v1727_v14 = vpop.f32.mrb[25].mxu1  ;;  %3113 = vst [vmem:[%s4955_s6 + $0x90] sm:$0xff] %v3085_v13  ;;  %v3086_v23 = vmax.f32 %v3058_v26, 0.0 }
 0x1ea   : > { %v3702_v25 = vpop.f32.mrb[26].mxu1  ;;  %3111 = vst [vmem:[%s4955_s6 + $0x80] sm:$0xff] %v3083_v31  ;;  %v3084_v36 = vmax.f32 %v3056_v33, 0.0  ;;  %v3817_v37 = vpop.f32.mrb[20].mxu0 }
 0x1eb   : > { %v1730_v28 = vpop.f32.mrb[27].mxu1  ;;  %3114 = vst [vmem:[%s4955_s6 + $0x98] sm:$0xff] %v3086_v23  ;;  %v3845_v44 = vadd.f32 %v3817_v37, %v3697_v4  ;;  %v2973_v45 = vpop.f32.mrb[21].mxu0 }
 0x1ec   : > { %3112 = vst [vmem:[%s4955_s6 + $0x88] sm:$0xff] %v3084_v36  ;;  %v3846_v9 = vadd.f32 %v2973_v45, %v1711_v8  ;;  %v3818_v43 = vpop.f32.mrb[22].mxu0 }
 0x1ed   : > { %v3061_v10 = vadd.f32 %v3845_v44, %v4949_v24  ;;  %v3847_v39 = vadd.f32 %v3818_v43, %v3698_v53  ;;  %v2976_v41 = vpop.f32.mrb[23].mxu0 }
 0x1ee   : > { %v3059_v49 = vadd.f32 %v3846_v9, %v4949_v24  ;;  %v3848_v54 = vadd.f32 %v2976_v41, %v1714_v3 }
 0x1ef   : > { %v3089_v34 = vmax.f32 %v3061_v10, 0.0  ;;  %v3062_v51 = vadd.f32 %v3847_v39, %v4949_v24 }
 0x1f0   : > { %v3087_v56 = vmax.f32 %v3059_v49, 0.0  ;;  %v3060_v11 = vadd.f32 %v3848_v54, %v4949_v24 }
 0x1f1   : > { %3117 = vst [vmem:[%s4955_s6 + $0xb0] sm:$0xff] %v3089_v34  ;;  %v3090_v46 = vmax.f32 %v3062_v51, 0.0 }
 0x1f2   : > { %3115 = vst [vmem:[%s4955_s6 + $0xa0] sm:$0xff] %v3087_v56  ;;  %v3088_v55 = vmax.f32 %v3060_v11, 0.0  ;;  %v3821_v59 = vpop.f32.mrb[24].mxu0 }
 0x1f3   : > { %3118 = vst [vmem:[%s4955_s6 + $0xb8] sm:$0xff] %v3090_v46  ;;  %v3849_v5 = vadd.f32 %v3821_v59, %v3701_v27  ;;  %v2989_v22 = vpop.f32.mrb[25].mxu0 }
 0x1f4   : > { %3116 = vst [vmem:[%s4955_s6 + $0xa8] sm:$0xff] %v3088_v55  ;;  %v3850_v60 = vadd.f32 %v2989_v22, %v1727_v14  ;;  %v3822_v2 = vpop.f32.mrb[26].mxu0 }
 0x1f5   : > { %v3065_v62 = vadd.f32 %v3849_v5, %v4949_v24  ;;  %v3851_v63 = vadd.f32 %v3822_v2, %v3702_v25  ;;  %v2992_v29 = vpop.f32.mrb[27].mxu0 }
 0x1f6   : > { %v3063_v7 = vadd.f32 %v3850_v60, %v4949_v24  ;;  %v3852_v12 = vadd.f32 %v2992_v29, %v1730_v28 }
 0x1f7   : > { %v3093_v61 = vmax.f32 %v3065_v62, 0.0  ;;  %v3066_v15 = vadd.f32 %v3851_v63, %v4949_v24 }
 0x1f8   : > { %v3091_v40 = vmax.f32 %v3063_v7, 0.0  ;;  %v3064_v16 = vadd.f32 %v3852_v12, %v4949_v24 }
 0x1f9   : > { %3121 = vst [vmem:[%s4955_s6 + $0xd0] sm:$0xff] %v3093_v61  ;;  %v3094_v6 = vmax.f32 %v3066_v15, 0.0 }
 0x1fa   : > { %3119 = vst [vmem:[%s4955_s6 + $0xc0] sm:$0xff] %v3091_v40  ;;  %v3092_v52 = vmax.f32 %v3064_v16, 0.0 }
 0x1fb   : > { %3122 = vst [vmem:[%s4955_s6 + $0xd8] sm:$0xff] %v3094_v6 }
 0x1fc   : > { %3120 = vst [vmem:[%s4955_s6 + $0xc8] sm:$0xff] %v3092_v52 }
 0x1fd   : > { %4192 = shalt.err (!%p4189_p3)
}
 0x1fe   : > { %s4193_s25 = scalar_lea.hbm %s5015_s11, 3584  ;;  %s4197_s28 = scalar_lea.hbm %s5068_s3, 7168 }
 0x1ff   : > { %p4194_p4 = scmp.ne.s32.totalorder %s5015_s11, %s4193_s25  ;;  %p4198_p9 = scmp.lt.u32.totalorder %s5015_s11, %s5068_s3 }
 0x200   : > { %p4199_p10 = scmp.lt.u32.totalorder %s4197_s28, %s4193_s25  ;;  %p4201_p12 = scmp.lt.u32.totalorder %s4193_s25, %s5015_s11 }
 0x201   : > { %p4195_p7 = pnand %p4194_p4, %p4304_p5 }
 0x202   : > { %p4200_p11 = por %p4199_p10, %p4198_p9 }
 0x203   : > { %p4196_p8 = pneg %p4195_p7 }
 0x204   : > { %p4202_p13 = por %p4201_p12, %p4200_p11 }
 0x206   : > { %p4203_p0 = pnand %p4202_p13, %p4196_p8 }
 0x208   : > { %4206 = shalt.err (!%p4203_p0)
}
 0x209   : > { %s4244_s4 = smov 128   ;;  %s4245_s5 = smov 8  }
 0x20a   : > { %4062 = dma.vmem_to_hbm [thread:$0]  (%p4304_p5), %s5017_s8, 3584, %s5015_s11, %s5024_s16, %s4244_s4, %s4244_s4, %s4245_s5  }
 0x20b PF: > { %p4068_p1 = scmp.ge.s32.totalorder %s4241_s15, 2  ;;  %s3152_s6 = sand.u32 1, %s4229_s12  }
 0x20c   : > { %s3153_s7 = scalar_lea.sflag [#allocation3], %s3152_s6 }
 0x20d   : > { %p4065_p2 = pnand %p4068_p1, %p4308_p6 }
 0x20f   : > { %4224 = dma.done.wait (!%p4065_p2), %s3153_s7, 3584  }
 0x210   : > { %4226 = vsyncadd (!%p4065_p2), %s3153_s7, 4294963712  ;;  %p13_p3 = scmp.ge.s32.totalorder %s4291_s18, 4   ;;  %s5071_s12 = smov %s4233_s13 }
 0x211   : > { %s5072_s13 = smov %s4237_s14  ;;  %s5073_s14 = smov %s4302_s21 }
 0x212   : > { %s5074_s15 = smov %s4291_s18  ;;  %15 = sbr.rel (!%p13_p3) target bundleno = 3 (0x3), region = 75 }
 0x219   :  { %3158 = vsyncpa [#allocation3], 1 }
 0x21a   :  { %3160 = vsyncpa [#allocation3 + $0x1], 1 }

</bundles_post_ra>
